<compile_context>
chip_gen: v6e
topology: v6e:2x2x1
jax: 0.10.0
libtpu: 0.0.40
codegen_flags: <defaults>
</compile_context>

<pallas_src>
import functools
import math

import jax
import jax.numpy as jnp
from jax.experimental import pallas as pl
from jax.experimental.pallas import tpu as pltpu


# ----------------------------------------------------------------------------
# helpers
# ----------------------------------------------------------------------------
def _round_up(x, m):
    return ((x + m - 1) // m) * m


# ----------------------------------------------------------------------------
# Pallas kernels
# ----------------------------------------------------------------------------
def _matmul_bias_act_kernel(a_ref, b_ref, bias_ref, o_ref, acc_ref, *, relu):
    """Tiled o = maybe_relu(A @ B + bias); f32 accumulation in VMEM scratch."""
    @pl.when(pl.program_id(2) == 0)
    def _():
        acc_ref[...] = jnp.zeros_like(acc_ref)

    acc_ref[...] += jnp.dot(a_ref[...], b_ref[...],
                            preferred_element_type=jnp.float32)

    @pl.when(pl.program_id(2) == pl.num_programs(2) - 1)
    def _():
        out = acc_ref[...] + bias_ref[...]
        if relu:
            out = jnp.maximum(out, 0.0)
        o_ref[...] = out.astype(o_ref.dtype)


def _avgpool_kernel(x_ref, o_ref, *, inv_s):
    """x: (tm, S, C) -> mean over the bin axis S -> (tm, C) lane-dense output."""
    o_ref[...] = jnp.sum(x_ref[...], axis=1) * inv_s


# ----------------------------------------------------------------------------
# Pallas wrappers
# ----------------------------------------------------------------------------
def fused_matmul(a, b, bias, relu, *, tm=256, tn=256, tk=512):
    """a: (M, K) f32/bf16, b: (K, N) f32/bf16, bias: (N,) f32 -> (M, N) f32.

    Tiled over (M/tm, N/tn, K/tk) with an f32 accumulator; bf16 MXU operands.
    """
    M, K = a.shape
    K2, N = b.shape
    assert K == K2

    # Shrink tiles to the (padded) problem so tiny layers don't over-pad,
    # while large layers still get pipelined 256/512 tiles.
    tm = min(tm, _round_up(M, 8))
    tn = min(tn, _round_up(N, 128))
    tk = min(tk, _round_up(K, 128))
    Mp, Kp, Np = _round_up(M, tm), _round_up(K, tk), _round_up(N, tn)

    a_p = jnp.pad(a, ((0, Mp - M), (0, Kp - K))).astype(jnp.bfloat16)
    b_p = jnp.pad(b.astype(jnp.bfloat16), ((0, Kp - K), (0, Np - N)))
    bias_p = jnp.pad(bias.astype(jnp.float32), (0, Np - N)).reshape(1, Np)

    grid = (Mp // tm, Np // tn, Kp // tk)
    out = pl.pallas_call(
        functools.partial(_matmul_bias_act_kernel, relu=relu),
        out_shape=jax.ShapeDtypeStruct((Mp, Np), jnp.float32),
        grid_spec=pltpu.PrefetchScalarGridSpec(
            num_scalar_prefetch=0,
            grid=grid,
            in_specs=[
                pl.BlockSpec((tm, tk), lambda i, j, k: (i, k)),
                pl.BlockSpec((tk, tn), lambda i, j, k: (k, j)),
                pl.BlockSpec((1, tn), lambda i, j, k: (0, j)),
            ],
            out_specs=pl.BlockSpec((tm, tn), lambda i, j, k: (i, j)),
            scratch_shapes=[pltpu.VMEM((tm, tn), jnp.float32)],
        ),
        compiler_params=pltpu.CompilerParams(
            dimension_semantics=("parallel", "parallel", "arbitrary"),
        ),
    )(a_p, b_p, bias_p)
    return out[:M, :N]


def adaptive_avgpool_4x4(x_nhwc):
    """nn.AdaptiveAvgPool2d((4,4)) on NHWC input.  Returns (N*16, C) rows in
    (n, oh, ow) order with channels lane-dense."""
    N, H, W, C = x_nhwc.shape
    # TODO(synk): uniform-bin pooling only; PyTorch's unequal-bin case
    #             (H or W not divisible by 4) is not handled.
    assert H % 4 == 0 and W % 4 == 0, (H, W)
    bh, bw = H // 4, W // 4
    S = bh * bw

    # (N,H,W,C) -> (N,4,bh,4,bw,C) -> (N,4,4,bh,bw,C) -> (N*16, S, C)
    xb = (x_nhwc.reshape(N, 4, bh, 4, bw, C)
                .transpose(0, 1, 3, 2, 4, 5)
                .reshape(N * 16, S, C)
                .astype(jnp.float32))

    M = N * 16
    Cp = _round_up(C, 128)
    tm = min(256, _round_up(M, 8))
    Mp = _round_up(M, tm)
    xb_p = jnp.pad(xb, ((0, Mp - M), (0, 0), (0, Cp - C)))

    out = pl.pallas_call(
        functools.partial(_avgpool_kernel, inv_s=1.0 / float(S)),
        out_shape=jax.ShapeDtypeStruct((Mp, Cp), jnp.float32),
        grid=(Mp // tm,),
        in_specs=[pl.BlockSpec((tm, S, Cp), lambda i: (i, 0, 0))],
        out_specs=pl.BlockSpec((tm, Cp), lambda i: (i, 0)),
        compiler_params=pltpu.CompilerParams(
            dimension_semantics=("parallel",),
        ),
    )(xb_p)
    return out[:M, :C]


# ----------------------------------------------------------------------------
# parameter construction (deterministic, synthetic) + constant folding
# ----------------------------------------------------------------------------
_BN_EPS = 1e-5


def init_inception_aux_params(key, in_channels, classes_num):
    k_conv, k_w1, k_b1, k_w2, k_b2 = jax.random.split(key, 5)

    # BasicConv2d(in_channels, 128, kernel_size=1): Conv2d(..., bias=False) + BN.
    w_conv = jnp.clip(
        jax.random.normal(k_conv, (128, in_channels), jnp.float32) * 0.01,
        -0.02, 0.02)
    # fresh BatchNorm2d in eval mode: gamma=1, beta=0, mean=0, var=1
    bn_scale = jnp.full((128,), 1.0 / math.sqrt(1.0 + _BN_EPS), jnp.float32)
    bn_bias = jnp.zeros((128,), jnp.float32)
    # Fold BN scale into the weight columns (free constant fold).
    conv_w = (w_conv.T * bn_scale[None, :]).astype(jnp.bfloat16)   # (C, 128)
    conv_b = bn_bias                                               # (128,)

    # fc1: Linear(2048, 1024)
    lim1 = 1.0 / math.sqrt(2048.0)
    w1 = jax.random.uniform(k_w1, (1024, 2048), jnp.float32, minval=-lim1, maxval=lim1)
    b1 = jax.random.uniform(k_b1, (1024,), jnp.float32, minval=-lim1, maxval=lim1)
    # PyTorch flattens (N,128,4,4) channel-major (index c*16+s); our NHWC
    # features flatten spatial-major (index s*128+c).  Permute the fc1 weight
    # input dimension once at build time so no activation transpose is needed.
    j = jnp.arange(2048)
    perm = (j % 128) * 16 + (j // 128)
    fc1_w = w1[:, perm].T.astype(jnp.bfloat16)                     # (2048, 1024)

    # fc2: Linear(1024, classes_num)
    lim2 = 1.0 / math.sqrt(1024.0)
    w2 = jax.random.uniform(k_w2, (classes_num, 1024), jnp.float32, minval=-lim2, maxval=lim2)
    b2 = jax.random.uniform(k_b2, (classes_num,), jnp.float32, minval=-lim2, maxval=lim2)
    fc2_w = w2.T.astype(jnp.bfloat16)                              # (1024, classes)

    return {
        "conv_w": conv_w, "conv_b": conv_b,
        "fc1_w": fc1_w, "fc1_b": b1,
        "fc2_w": fc2_w, "fc2_b": b2,
    }


# ----------------------------------------------------------------------------
# forward pass
# ----------------------------------------------------------------------------
def inception_aux_forward(x, params):
    """x: (N, C, H, W) NCHW (PyTorch layout).  Returns (N, classes) f32."""
    N, C, H, W = x.shape

    # NCHW -> NHWC once at the module boundary (channels on the 128-lane axis).
    x_nhwc = jnp.transpose(x, (0, 2, 3, 1))

    # AdaptiveAvgPool2d((4,4))  -> (N*16, C), lane-dense channels.
    pooled = adaptive_avgpool_4x4(x_nhwc)

    # BasicConv2d(C, 128, k=1): 1x1 conv == matmul; BN scale pre-folded into
    # the weight, so the kernel epilogue is bias-add + ReLU.
    conv = fused_matmul(pooled, params["conv_w"], params["conv_b"], relu=True)  # (N*16, 128)

    # flatten (fc1 weight columns were pre-permuted to match PyTorch's
    # channel-major flatten, so this reshape is a pure view).
    feat = conv.reshape(N, 16 * 128)                                            # (N, 2048)

    # fc1 + ReLU; Dropout(p=0.7) is the identity in eval mode.
    h1 = fused_matmul(feat, params["fc1_w"], params["fc1_b"], relu=True)        # (N, 1024)

    # fc2 (logits, no activation)
    out = fused_matmul(h1, params["fc2_w"], params["fc2_b"], relu=False)        # (N, classes)
    return out


# ----------------------------------------------------------------------------
# main
# ----------------------------------------------------------------------------
if __name__ == "__main__":
    IN_CHANNELS = 32
    CLASSES = 10
    BATCH = 2
    SPATIAL = 16   # must be divisible by 4 (uniform adaptive-pool bins)

    root = jax.random.PRNGKey(0)
    k_params, k_input = jax.random.split(root)

    params = init_inception_aux_params(k_params, IN_CHANNELS, CLASSES)
    x = jax.random.normal(k_input, (BATCH, IN_CHANNELS, SPATIAL, SPATIAL), jnp.float32)

    fwd = jax.jit(inception_aux_forward)
    out = jax.block_until_ready(fwd(x, params))

    assert out.shape == (BATCH, CLASSES), out.shape
    assert bool(jnp.all(jnp.isfinite(out)))
    print("KERNEL_OK")
</pallas_src>

<mosaic_0001>
module attributes {stable_mosaic.version = 11 : i64} {
  func.func @_avgpool_kernel(%arg0: i32, %arg1: memref<32x16x128xf32, #tpu.memory_space<vmem>>, %arg2: memref<32x128xf32, #tpu.memory_space<vmem>>) attributes {dimension_semantics = [#tpu.dimension_semantics<parallel>], iteration_bounds = array<i64: 1>, scalar_prefetch = 0 : i64, scratch_operands = 0 : i64, tpu.core_type = #tpu.core_type<tc>, window_params = [{transform_indices = @transform_0, window_bounds = array<i64: 32, 16, 128>}, {transform_indices = @transform_1, window_bounds = array<i64: 32, 128>}]} {
    %c0 = arith.constant 0 : index
    %c0_0 = arith.constant 0 : index
    %c0_1 = arith.constant 0 : index
    %0 = vector.load %arg1[%c0, %c0_0, %c0_1] : memref<32x16x128xf32, #tpu.memory_space<vmem>>, vector<32x16x128xf32>
    %cst = arith.constant dense<0.000000e+00> : vector<32x128xf32>
    %1 = vector.multi_reduction <add>, %0, %cst [1] : vector<32x16x128xf32> to vector<32x128xf32>
    %cst_2 = arith.constant 6.250000e-02 : f32
    %2 = vector.broadcast %cst_2 : f32 to vector<32x128xf32>
    %3 = arith.mulf %1, %2 : vector<32x128xf32>
    %c0_3 = arith.constant 0 : index
    %c0_4 = arith.constant 0 : index
    %4 = vector.load %arg2[%c0_3, %c0_4] : memref<32x128xf32, #tpu.memory_space<vmem>>, vector<32x128xf32>
    tpu.vector_store %arg2[%c0_3, %c0_4], %3 {strides = array<i32>} : memref<32x128xf32, #tpu.memory_space<vmem>>, vector<32x128xf32>,
    return
  }
  func.func @transform_0(%arg0: i32) -> (i32, i32, i32) {
    %c0_i32 = arith.constant 0 : i32
    %c0_i32_0 = arith.constant 0 : i32
    %c0_i32_1 = arith.constant 0 : i32
    return %arg0, %c0_i32, %c0_i32_0 : i32, i32, i32
  }
  func.func @transform_1(%arg0: i32) -> (i32, i32) {
    %c0_i32 = arith.constant 0 : i32
    %c0_i32_0 = arith.constant 0 : i32
    return %arg0, %c0_i32 : i32, i32
  }
}

module attributes {stable_mosaic.version = 11 : i64} {
  func.func @_matmul_bias_act_kernel(%arg0: i32, %arg1: i32, %arg2: i32, %arg3: memref<8x512xbf16, #tpu.memory_space<vmem>>, %arg4: memref<512x256xbf16, #tpu.memory_space<vmem>>, %arg5: memref<1x256xf32, #tpu.memory_space<vmem>>, %arg6: memref<8x256xf32, #tpu.memory_space<vmem>>, %arg7: memref<8x256xf32, #tpu.memory_space<vmem>>) attributes {dimension_semantics = [#tpu.dimension_semantics<parallel>, #tpu.dimension_semantics<parallel>, #tpu.dimension_semantics<arbitrary>], iteration_bounds = array<i64: 1, 4, 4>, scalar_prefetch = 0 : i64, scratch_operands = 1 : i64, tpu.core_type = #tpu.core_type<tc>, window_params = [{transform_indices = @transform_0, window_bounds = array<i64: 8, 512>}, {transform_indices = @transform_1, window_bounds = array<i64: 512, 256>}, {transform_indices = @transform_2, window_bounds = array<i64: 1, 256>}, {transform_indices = @transform_3, window_bounds = array<i64: 8, 256>}]} {
    %c0_i32 = arith.constant 0 : i32
    %0 = arith.cmpi eq, %arg2, %c0_i32 : i32
    %1 = arith.extui %0 : i1 to i32
    %c0_i32_0 = arith.constant 0 : i32
    %2 = arith.cmpi ne, %1, %c0_i32_0 : i32
    scf.if %2 {
      %cst_9 = arith.constant 0.000000e+00 : f32
      %12 = vector.broadcast %cst_9 : f32 to vector<8x256xf32>
      %c0_10 = arith.constant 0 : index
      %c0_11 = arith.constant 0 : index
      %13 = vector.load %arg7[%c0_10, %c0_11] : memref<8x256xf32, #tpu.memory_space<vmem>>, vector<8x256xf32>
      tpu.vector_store %arg7[%c0_10, %c0_11], %12 {strides = array<i32>} : memref<8x256xf32, #tpu.memory_space<vmem>>, vector<8x256xf32>,
    } else {
    }
    %c0 = arith.constant 0 : index
    %c0_1 = arith.constant 0 : index
    %3 = vector.load %arg7[%c0, %c0_1] : memref<8x256xf32, #tpu.memory_space<vmem>>, vector<8x256xf32>
    %c0_2 = arith.constant 0 : index
    %c0_3 = arith.constant 0 : index
    %4 = vector.load %arg3[%c0_2, %c0_3] : memref<8x512xbf16, #tpu.memory_space<vmem>>, vector<8x512xbf16>
    %c0_4 = arith.constant 0 : index
    %c0_5 = arith.constant 0 : index
    %5 = vector.load %arg4[%c0_4, %c0_5] : memref<512x256xbf16, #tpu.memory_space<vmem>>, vector<512x256xbf16>
    %cst = arith.constant dense<0.000000e+00> : vector<8x256xf32>
    %6 = tpu.matmul %4, %5, %cst {dimension_numbers = #tpu.dot_dimension_numbers<[1], [0], [0], [1], [0, 0, 1, 1], [], []>} : vector<8x512xbf16>, vector<512x256xbf16>, vector<8x256xf32> -> vector<8x256xf32>
    %7 = arith.addf %3, %6 : vector<8x256xf32>
    %c0_6 = arith.constant 0 : index
    %c0_7 = arith.constant 0 : index
    %8 = vector.load %arg7[%c0_6, %c0_7] : memref<8x256xf32, #tpu.memory_space<vmem>>, vector<8x256xf32>
    tpu.vector_store %arg7[%c0_6, %c0_7], %7 {strides = array<i32>} : memref<8x256xf32, #tpu.memory_space<vmem>>, vector<8x256xf32>,
    %c3_i32 = arith.constant 3 : i32
    %9 = arith.cmpi eq, %arg2, %c3_i32 : i32
    %10 = arith.extui %9 : i1 to i32
    %c0_i32_8 = arith.constant 0 : i32
    %11 = arith.cmpi ne, %10, %c0_i32_8 : i32
    scf.if %11 {
      %c0_9 = arith.constant 0 : index
      %c0_10 = arith.constant 0 : index
      %12 = vector.load %arg7[%c0_9, %c0_10] : memref<8x256xf32, #tpu.memory_space<vmem>>, vector<8x256xf32>
      %c0_11 = arith.constant 0 : index
      %c0_12 = arith.constant 0 : index
      %13 = vector.load %arg5[%c0_11, %c0_12] : memref<1x256xf32, #tpu.memory_space<vmem>>, vector<1x256xf32>
      %14 = vector.broadcast %13 : vector<1x256xf32> to vector<8x256xf32>
      %15 = arith.addf %12, %14 : vector<8x256xf32>
      %cst_13 = arith.constant 0.000000e+00 : f32
      %16 = vector.broadcast %cst_13 : f32 to vector<8x256xf32>
      %17 = arith.maximumf %15, %16 : vector<8x256xf32>
      %c0_14 = arith.constant 0 : index
      %c0_15 = arith.constant 0 : index
      %18 = vector.load %arg6[%c0_14, %c0_15] : memref<8x256xf32, #tpu.memory_space<vmem>>, vector<8x256xf32>
      tpu.vector_store %arg6[%c0_14, %c0_15], %17 {strides = array<i32>} : memref<8x256xf32, #tpu.memory_space<vmem>>, vector<8x256xf32>,
    } else {
    }
    return
  }
  func.func @transform_0(%arg0: i32, %arg1: i32, %arg2: i32) -> (i32, i32) {
    %c0_i32 = arith.constant 0 : i32
    return %arg0, %arg2 : i32, i32
  }
  func.func @transform_1(%arg0: i32, %arg1: i32, %arg2: i32) -> (i32, i32) {
    %c0_i32 = arith.constant 0 : i32
    return %arg2, %arg1 : i32, i32
  }
  func.func @transform_2(%arg0: i32, %arg1: i32, %arg2: i32) -> (i32, i32) {
    %c0_i32 = arith.constant 0 : i32
    %c0_i32_0 = arith.constant 0 : i32
    return %c0_i32, %arg1 : i32, i32
  }
  func.func @transform_3(%arg0: i32, %arg1: i32, %arg2: i32) -> (i32, i32) {
    %c0_i32 = arith.constant 0 : i32
    return %arg0, %arg1 : i32, i32
  }
}

module attributes {stable_mosaic.version = 11 : i64} {
  func.func @_matmul_bias_act_kernel(%arg0: i32, %arg1: i32, %arg2: i32, %arg3: memref<32x128xbf16, #tpu.memory_space<vmem>>, %arg4: memref<128x128xbf16, #tpu.memory_space<vmem>>, %arg5: memref<1x128xf32, #tpu.memory_space<vmem>>, %arg6: memref<32x128xf32, #tpu.memory_space<vmem>>, %arg7: memref<32x128xf32, #tpu.memory_space<vmem>>) attributes {dimension_semantics = [#tpu.dimension_semantics<parallel>, #tpu.dimension_semantics<parallel>, #tpu.dimension_semantics<arbitrary>], iteration_bounds = array<i64: 1, 1, 1>, scalar_prefetch = 0 : i64, scratch_operands = 1 : i64, tpu.core_type = #tpu.core_type<tc>, window_params = [{transform_indices = @transform_0, window_bounds = array<i64: 32, 128>}, {transform_indices = @transform_1, window_bounds = array<i64: 128, 128>}, {transform_indices = @transform_2, window_bounds = array<i64: 1, 128>}, {transform_indices = @transform_3, window_bounds = array<i64: 32, 128>}]} {
    %c0_i32 = arith.constant 0 : i32
    %0 = arith.cmpi eq, %arg2, %c0_i32 : i32
    %1 = arith.extui %0 : i1 to i32
    %c0_i32_0 = arith.constant 0 : i32
    %2 = arith.cmpi ne, %1, %c0_i32_0 : i32
    scf.if %2 {
      %cst_10 = arith.constant 0.000000e+00 : f32
      %12 = vector.broadcast %cst_10 : f32 to vector<32x128xf32>
      %c0_11 = arith.constant 0 : index
      %c0_12 = arith.constant 0 : index
      %13 = vector.load %arg7[%c0_11, %c0_12] : memref<32x128xf32, #tpu.memory_space<vmem>>, vector<32x128xf32>
      tpu.vector_store %arg7[%c0_11, %c0_12], %12 {strides = array<i32>} : memref<32x128xf32, #tpu.memory_space<vmem>>, vector<32x128xf32>,
    } else {
    }
    %c0 = arith.constant 0 : index
    %c0_1 = arith.constant 0 : index
    %3 = vector.load %arg7[%c0, %c0_1] : memref<32x128xf32, #tpu.memory_space<vmem>>, vector<32x128xf32>
    %c0_2 = arith.constant 0 : index
    %c0_3 = arith.constant 0 : index
    %4 = vector.load %arg3[%c0_2, %c0_3] : memref<32x128xbf16, #tpu.memory_space<vmem>>, vector<32x128xbf16>
    %c0_4 = arith.constant 0 : index
    %c0_5 = arith.constant 0 : index
    %5 = vector.load %arg4[%c0_4, %c0_5] : memref<128x128xbf16, #tpu.memory_space<vmem>>, vector<128x128xbf16>
    %cst = arith.constant dense<0.000000e+00> : vector<32x128xf32>
    %6 = tpu.matmul %4, %5, %cst {dimension_numbers = #tpu.dot_dimension_numbers<[1], [0], [0], [1], [0, 0, 1, 1], [], []>} : vector<32x128xbf16>, vector<128x128xbf16>, vector<32x128xf32> -> vector<32x128xf32>
    %7 = arith.addf %3, %6 : vector<32x128xf32>
    %c0_6 = arith.constant 0 : index
    %c0_7 = arith.constant 0 : index
    %8 = vector.load %arg7[%c0_6, %c0_7] : memref<32x128xf32, #tpu.memory_space<vmem>>, vector<32x128xf32>
    tpu.vector_store %arg7[%c0_6, %c0_7], %7 {strides = array<i32>} : memref<32x128xf32, #tpu.memory_space<vmem>>, vector<32x128xf32>,
    %c0_i32_8 = arith.constant 0 : i32
    %9 = arith.cmpi eq, %arg2, %c0_i32_8 : i32
    %10 = arith.extui %9 : i1 to i32
    %c0_i32_9 = arith.constant 0 : i32
    %11 = arith.cmpi ne, %10, %c0_i32_9 : i32
    scf.if %11 {
      %c0_10 = arith.constant 0 : index
      %c0_11 = arith.constant 0 : index
      %12 = vector.load %arg7[%c0_10, %c0_11] : memref<32x128xf32, #tpu.memory_space<vmem>>, vector<32x128xf32>
      %c0_12 = arith.constant 0 : index
      %c0_13 = arith.constant 0 : index
      %13 = vector.load %arg5[%c0_12, %c0_13] : memref<1x128xf32, #tpu.memory_space<vmem>>, vector<1x128xf32>
      %14 = vector.broadcast %13 : vector<1x128xf32> to vector<32x128xf32>
      %15 = arith.addf %12, %14 : vector<32x128xf32>
      %cst_14 = arith.constant 0.000000e+00 : f32
      %16 = vector.broadcast %cst_14 : f32 to vector<32x128xf32>
      %17 = arith.maximumf %15, %16 : vector<32x128xf32>
      %c0_15 = arith.constant 0 : index
      %c0_16 = arith.constant 0 : index
      %18 = vector.load %arg6[%c0_15, %c0_16] : memref<32x128xf32, #tpu.memory_space<vmem>>, vector<32x128xf32>
      tpu.vector_store %arg6[%c0_15, %c0_16], %17 {strides = array<i32>} : memref<32x128xf32, #tpu.memory_space<vmem>>, vector<32x128xf32>,
    } else {
    }
    return
  }
  func.func @transform_0(%arg0: i32, %arg1: i32, %arg2: i32) -> (i32, i32) {
    %c0_i32 = arith.constant 0 : i32
    return %arg0, %arg2 : i32, i32
  }
  func.func @transform_1(%arg0: i32, %arg1: i32, %arg2: i32) -> (i32, i32) {
    %c0_i32 = arith.constant 0 : i32
    return %arg2, %arg1 : i32, i32
  }
  func.func @transform_2(%arg0: i32, %arg1: i32, %arg2: i32) -> (i32, i32) {
    %c0_i32 = arith.constant 0 : i32
    %c0_i32_0 = arith.constant 0 : i32
    return %c0_i32, %arg1 : i32, i32
  }
  func.func @transform_3(%arg0: i32, %arg1: i32, %arg2: i32) -> (i32, i32) {
    %c0_i32 = arith.constant 0 : i32
    return %arg0, %arg1 : i32, i32
  }
}

module attributes {stable_mosaic.version = 11 : i64} {
  func.func @_matmul_bias_act_kernel(%arg0: i32, %arg1: i32, %arg2: i32, %arg3: memref<8x512xbf16, #tpu.memory_space<vmem>>, %arg4: memref<512x128xbf16, #tpu.memory_space<vmem>>, %arg5: memref<1x128xf32, #tpu.memory_space<vmem>>, %arg6: memref<8x128xf32, #tpu.memory_space<vmem>>, %arg7: memref<8x128xf32, #tpu.memory_space<vmem>>) attributes {dimension_semantics = [#tpu.dimension_semantics<parallel>, #tpu.dimension_semantics<parallel>, #tpu.dimension_semantics<arbitrary>], iteration_bounds = array<i64: 1, 1, 2>, scalar_prefetch = 0 : i64, scratch_operands = 1 : i64, tpu.core_type = #tpu.core_type<tc>, window_params = [{transform_indices = @transform_0, window_bounds = array<i64: 8, 512>}, {transform_indices = @transform_1, window_bounds = array<i64: 512, 128>}, {transform_indices = @transform_2, window_bounds = array<i64: 1, 128>}, {transform_indices = @transform_3, window_bounds = array<i64: 8, 128>}]} {
    %c0_i32 = arith.constant 0 : i32
    %0 = arith.cmpi eq, %arg2, %c0_i32 : i32
    %1 = arith.extui %0 : i1 to i32
    %c0_i32_0 = arith.constant 0 : i32
    %2 = arith.cmpi ne, %1, %c0_i32_0 : i32
    scf.if %2 {
      %cst_9 = arith.constant 0.000000e+00 : f32
      %12 = vector.broadcast %cst_9 : f32 to vector<8x128xf32>
      %c0_10 = arith.constant 0 : index
      %c0_11 = arith.constant 0 : index
      %13 = vector.load %arg7[%c0_10, %c0_11] : memref<8x128xf32, #tpu.memory_space<vmem>>, vector<8x128xf32>
      tpu.vector_store %arg7[%c0_10, %c0_11], %12 {strides = array<i32>} : memref<8x128xf32, #tpu.memory_space<vmem>>, vector<8x128xf32>,
    } else {
    }
    %c0 = arith.constant 0 : index
    %c0_1 = arith.constant 0 : index
    %3 = vector.load %arg7[%c0, %c0_1] : memref<8x128xf32, #tpu.memory_space<vmem>>, vector<8x128xf32>
    %c0_2 = arith.constant 0 : index
    %c0_3 = arith.constant 0 : index
    %4 = vector.load %arg3[%c0_2, %c0_3] : memref<8x512xbf16, #tpu.memory_space<vmem>>, vector<8x512xbf16>
    %c0_4 = arith.constant 0 : index
    %c0_5 = arith.constant 0 : index
    %5 = vector.load %arg4[%c0_4, %c0_5] : memref<512x128xbf16, #tpu.memory_space<vmem>>, vector<512x128xbf16>
    %cst = arith.constant dense<0.000000e+00> : vector<8x128xf32>
    %6 = tpu.matmul %4, %5, %cst {dimension_numbers = #tpu.dot_dimension_numbers<[1], [0], [0], [1], [0, 0, 1, 1], [], []>} : vector<8x512xbf16>, vector<512x128xbf16>, vector<8x128xf32> -> vector<8x128xf32>
    %7 = arith.addf %3, %6 : vector<8x128xf32>
    %c0_6 = arith.constant 0 : index
    %c0_7 = arith.constant 0 : index
    %8 = vector.load %arg7[%c0_6, %c0_7] : memref<8x128xf32, #tpu.memory_space<vmem>>, vector<8x128xf32>
    tpu.vector_store %arg7[%c0_6, %c0_7], %7 {strides = array<i32>} : memref<8x128xf32, #tpu.memory_space<vmem>>, vector<8x128xf32>,
    %c1_i32 = arith.constant 1 : i32
    %9 = arith.cmpi eq, %arg2, %c1_i32 : i32
    %10 = arith.extui %9 : i1 to i32
    %c0_i32_8 = arith.constant 0 : i32
    %11 = arith.cmpi ne, %10, %c0_i32_8 : i32
    scf.if %11 {
      %c0_9 = arith.constant 0 : index
      %c0_10 = arith.constant 0 : index
      %12 = vector.load %arg7[%c0_9, %c0_10] : memref<8x128xf32, #tpu.memory_space<vmem>>, vector<8x128xf32>
      %c0_11 = arith.constant 0 : index
      %c0_12 = arith.constant 0 : index
      %13 = vector.load %arg5[%c0_11, %c0_12] : memref<1x128xf32, #tpu.memory_space<vmem>>, vector<1x128xf32>
      %14 = vector.broadcast %13 : vector<1x128xf32> to vector<8x128xf32>
      %15 = arith.addf %12, %14 : vector<8x128xf32>
      %c0_13 = arith.constant 0 : index
      %c0_14 = arith.constant 0 : index
      %16 = vector.load %arg6[%c0_13, %c0_14] : memref<8x128xf32, #tpu.memory_space<vmem>>, vector<8x128xf32>
      tpu.vector_store %arg6[%c0_13, %c0_14], %15 {strides = array<i32>} : memref<8x128xf32, #tpu.memory_space<vmem>>, vector<8x128xf32>,
    } else {
    }
    return
  }
  func.func @transform_0(%arg0: i32, %arg1: i32, %arg2: i32) -> (i32, i32) {
    %c0_i32 = arith.constant 0 : i32
    return %arg0, %arg2 : i32, i32
  }
  func.func @transform_1(%arg0: i32, %arg1: i32, %arg2: i32) -> (i32, i32) {
    %c0_i32 = arith.constant 0 : i32
    return %arg2, %arg1 : i32, i32
  }
  func.func @transform_2(%arg0: i32, %arg1: i32, %arg2: i32) -> (i32, i32) {
    %c0_i32 = arith.constant 0 : i32
    %c0_i32_0 = arith.constant 0 : i32
    return %c0_i32, %arg1 : i32, i32
  }
  func.func @transform_3(%arg0: i32, %arg1: i32, %arg2: i32) -> (i32, i32) {
    %c0_i32 = arith.constant 0 : i32
    return %arg0, %arg1 : i32, i32
  }
}

</mosaic_0001>

<bundles_post_ra>
// kernel: inception_aux_forward.4
= control target key start
LH: loop header
LB: loop body
LE: loop exit
PB: predicated region body
PF: predicated region fallthrough
CT: control target
= control target key end

     0   :  { %vm360_vm0 = vcmask 1041409   ;;  %vm362_vm1 = vcmask 1042434   ;;  %vm364_vm2 = vcmask 1043459   ;;  %vm366_vm3 = vcmask 1044484   ;;  %s721_s0 = inlined_call_operand.vmem [shape: f32[32,16,128], index: 0, kind: input, shape index: {}]   ;;  %s722_s1 = inlined_call_operand.vmem [shape: f32[32,128], index: 1, kind: output, shape index: {}]  }
   0x1   :  { %v8_v0 = vld [vmem:[%s721_s0] sm:$0xff]  ;;  %v9_v1 = vld [vmem:[%s721_s0 + $0x8] sm:$0xff]  ;;  %v10_v2 = vld [vmem:[%s721_s0 + $0x10] sm:$0xff]  ;;  %vm368_vm4 = vcmask 1045509   ;;  %vm370_vm5 = vcmask 1046534   ;;  %vm372_vm6 = vcmask 1047559  }
   0x2   :  { %v11_v3 = vld [vmem:[%s721_s0 + $0x18] sm:$0xff]  ;;  %v12_v4 = vld [vmem:[%s721_s0 + $0x20] sm:$0xff]  ;;  %v13_v5 = vld [vmem:[%s721_s0 + $0x28] sm:$0xff]  ;;  %v72_v6 = vadd.f32 %v9_v1, %v8_v0 }
   0x3   :  { %v14_v7 = vld [vmem:[%s721_s0 + $0x30] sm:$0xff]  ;;  %v15_v8 = vld [vmem:[%s721_s0 + $0x38] sm:$0xff]  ;;  %v16_v9 = vld [vmem:[%s721_s0 + $0x40] sm:$0xff]  ;;  %v79_v10 = vadd.f32 %v11_v3, %v10_v2  ;;  %v86_v11 = vadd.f32 %v13_v5, %v12_v4 }
   0x4   :  { %v17_v12 = vld [vmem:[%s721_s0 + $0x48] sm:$0xff]  ;;  %v18_v13 = vld [vmem:[%s721_s0 + $0x50] sm:$0xff]  ;;  %v19_v14 = vld [vmem:[%s721_s0 + $0x58] sm:$0xff]  ;;  %v73_v15 = vrot.slane %v72_v6, 4  ;;  %v93_v16 = vadd.f32 %v15_v8, %v14_v7 }
   0x5   :  { %v20_v17 = vld [vmem:[%s721_s0 + $0x60] sm:$0xff]  ;;  %v21_v18 = vld [vmem:[%s721_s0 + $0x68] sm:$0xff]  ;;  %v22_v19 = vld [vmem:[%s721_s0 + $0x70] sm:$0xff]  ;;  %v80_v20 = vrot.slane %v79_v10, 4  ;;  %v87_v21 = vrot.slane %v86_v11, 4  ;;  %v100_v22 = vadd.f32 %v17_v12, %v16_v9  ;;  %v107_v23 = vadd.f32 %v19_v14, %v18_v13 }
   0x6   :  { %v23_v24 = vld [vmem:[%s721_s0 + $0x78] sm:$0xff]  ;;  %v74_v25 = vadd.f32 %v73_v15, %v72_v6  ;;  %v94_v26 = vrot.slane %v93_v16, 4  ;;  %v114_v27 = vadd.f32 %v21_v18, %v20_v17  ;;  %v24_v52 = vld [vmem:[%s721_s0 + $0x80] sm:$0xff]  ;;  %v25_v53 = vld [vmem:[%s721_s0 + $0x88] sm:$0xff] }
   0x7   :  { %v81_v28 = vadd.f32 %v80_v20, %v79_v10  ;;  %v88_v29 = vadd.f32 %v87_v21, %v86_v11  ;;  %v101_v30 = vrot.slane %v100_v22, 4  ;;  %v108_v31 = vrot.slane %v107_v23, 4  ;;  %v26_v54 = vld [vmem:[%s721_s0 + $0x90] sm:$0xff]  ;;  %v27_v59 = vld [vmem:[%s721_s0 + $0x98] sm:$0xff]  ;;  %v28_v60 = vld [vmem:[%s721_s0 + $0xa0] sm:$0xff] }
   0x8   :  { %v75_v32 = vrot.slane %v74_v25, 2  ;;  %v95_v33 = vadd.f32 %v94_v26, %v93_v16  ;;  %v115_v34 = vrot.slane %v114_v27, 4  ;;  %v121_v35 = vadd.f32 %v23_v24, %v22_v19  ;;  %v29_v61 = vld [vmem:[%s721_s0 + $0xa8] sm:$0xff]  ;;  %v30_v2 = vld [vmem:[%s721_s0 + $0xb0] sm:$0xff]  ;;  %v31_v3 = vld [vmem:[%s721_s0 + $0xb8] sm:$0xff] }
   0x9   :  { %v82_v36 = vrot.slane %v81_v28, 2  ;;  %v89_v37 = vrot.slane %v88_v29, 2  ;;  %v102_v38 = vadd.f32 %v101_v30, %v100_v22  ;;  %v109_v39 = vadd.f32 %v108_v31, %v107_v23  ;;  %v32_v4 = vld [vmem:[%s721_s0 + $0xc0] sm:$0xff]  ;;  %v33_v9 = vld [vmem:[%s721_s0 + $0xc8] sm:$0xff]  ;;  %v34_v10 = vld [vmem:[%s721_s0 + $0xd0] sm:$0xff] }
   0xa   :  { %v76_v40 = vadd.f32 %v75_v32, %v74_v25  ;;  %v96_v41 = vrot.slane %v95_v33, 2  ;;  %v116_v42 = vadd.f32 %v115_v34, %v114_v27  ;;  %v122_v43 = vrot.slane %v121_v35, 4  ;;  %v35_v11 = vld [vmem:[%s721_s0 + $0xd8] sm:$0xff]  ;;  %v36_v16 = vld [vmem:[%s721_s0 + $0xe0] sm:$0xff]  ;;  %v37_v17 = vld [vmem:[%s721_s0 + $0xe8] sm:$0xff] }
   0xb   :  { %v83_v44 = vadd.f32 %v82_v36, %v81_v28  ;;  %v90_v45 = vadd.f32 %v89_v37, %v88_v29  ;;  %v103_v46 = vrot.slane %v102_v38, 2  ;;  %v110_v47 = vrot.slane %v109_v39, 2  ;;  %v38_v26 = vld [vmem:[%s721_s0 + $0xf0] sm:$0xff]  ;;  %v39_v27 = vld [vmem:[%s721_s0 + $0xf8] sm:$0xff] }
   0xc   :  { %v77_v48 = vrot.slane %v76_v40, 1  ;;  %v97_v49 = vadd.f32 %v96_v41, %v95_v33  ;;  %v117_v50 = vrot.slane %v116_v42, 2  ;;  %v123_v51 = vadd.f32 %v122_v43, %v121_v35 }
   0xd   :  { %v84_v55 = vrot.slane %v83_v44, 1  ;;  %v91_v56 = vrot.slane %v90_v45, 1  ;;  %v104_v57 = vadd.f32 %v103_v46, %v102_v38  ;;  %v111_v58 = vadd.f32 %v110_v47, %v109_v39 }
   0xe   :  { %v483_v62 = vadd.f32 %v77_v48, %v76_v40  ;;  %v98_v63 = vrot.slane %v97_v49, 1  ;;  %v118_v0 = vadd.f32 %v117_v50, %v116_v42  ;;  %v124_v1 = vrot.slane %v123_v51, 2 }
   0xf   :  { %v494_v5 = vadd.f32 %v84_v55, %v83_v44  ;;  %v496_v6 = vadd.f32 %v91_v56, %v90_v45  ;;  %v105_v7 = vrot.slane %v104_v57, 1  ;;  %v112_v8 = vrot.slane %v111_v58, 1 }
  0x10   :  { %v507_v12 = vadd.f32 %v98_v63, %v97_v49  ;;  %v119_v13 = vrot.slane %v118_v0, 1  ;;  %v125_v14 = vadd.f32 %v124_v1, %v123_v51  ;;  %v128_v15 = vadd.f32 %v25_v53, %v24_v52  ;;  %v42_v63 = vld [vmem:[%s721_s0 + $0x110] sm:$0xff] }
  0x11   :  { %v515_v18 = vadd.f32 %v105_v7, %v104_v57  ;;  %v517_v19 = vadd.f32 %v112_v8, %v111_v58  ;;  %v135_v20 = vadd.f32 %v27_v59, %v26_v54  ;;  %v142_v21 = vadd.f32 %v29_v61, %v28_v60  ;;  %v40_v60 = vld [vmem:[%s721_s0 + $0x100] sm:$0xff]  ;;  %v41_v61 = vld [vmem:[%s721_s0 + $0x108] sm:$0xff] }
  0x12   :  { %v519_v22 = vadd.f32 %v119_v13, %v118_v0  ;;  %v126_v23 = vrot.slane %v125_v14, 1  ;;  %v129_v24 = vrot.slane %v128_v15, 4  ;;  %v149_v25 = vadd.f32 %v31_v3, %v30_v2  ;;  %v44_v7 = vld [vmem:[%s721_s0 + $0x120] sm:$0xff]  ;;  %v45_v8 = vld [vmem:[%s721_s0 + $0x128] sm:$0xff] }
  0x13   :  { %v136_v28 = vrot.slane %v135_v20, 4  ;;  %v143_v29 = vrot.slane %v142_v21, 4  ;;  %v156_v30 = vadd.f32 %v33_v9, %v32_v4  ;;  %v163_v31 = vadd.f32 %v35_v11, %v34_v10  ;;  %v43_v4 = vld [vmem:[%s721_s0 + $0x118] sm:$0xff] }
  0x14   :  { %v527_v32 = vadd.f32 %v126_v23, %v125_v14  ;;  %v130_v33 = vadd.f32 %v129_v24, %v128_v15  ;;  %v150_v34 = vrot.slane %v149_v25, 4  ;;  %v170_v35 = vadd.f32 %v37_v17, %v36_v16  ;;  %v46_v14 = vld [vmem:[%s721_s0 + $0x130] sm:$0xff]  ;;  %v47_v15 = vld [vmem:[%s721_s0 + $0x138] sm:$0xff]  ;;  %v48_v16 = vld [vmem:[%s721_s0 + $0x140] sm:$0xff] }
  0x15   :  { %v137_v36 = vadd.f32 %v136_v28, %v135_v20  ;;  %v144_v37 = vadd.f32 %v143_v29, %v142_v21  ;;  %v157_v38 = vrot.slane %v156_v30, 4  ;;  %v164_v39 = vrot.slane %v163_v31, 4  ;;  %v49_v24 = vld [vmem:[%s721_s0 + $0x148] sm:$0xff] }
  0x16   :  { %v131_v40 = vrot.slane %v130_v33, 2  ;;  %v151_v41 = vadd.f32 %v150_v34, %v149_v25  ;;  %v171_v42 = vrot.slane %v170_v35, 4  ;;  %v177_v43 = vadd.f32 %v39_v27, %v38_v26  ;;  %v50_v25 = vld [vmem:[%s721_s0 + $0x150] sm:$0xff]  ;;  %v51_v26 = vld [vmem:[%s721_s0 + $0x158] sm:$0xff] }
  0x17   :  { %v138_v44 = vrot.slane %v137_v36, 2  ;;  %v145_v45 = vrot.slane %v144_v37, 2  ;;  %v158_v46 = vadd.f32 %v157_v38, %v156_v30  ;;  %v165_v47 = vadd.f32 %v164_v39, %v163_v31  ;;  %v52_v31 = vld [vmem:[%s721_s0 + $0x160] sm:$0xff] }
  0x18   :  { %v132_v48 = vadd.f32 %v131_v40, %v130_v33  ;;  %v152_v49 = vrot.slane %v151_v41, 2  ;;  %v172_v50 = vadd.f32 %v171_v42, %v170_v35  ;;  %v178_v51 = vrot.slane %v177_v43, 4  ;;  %v53_v33 = vld [vmem:[%s721_s0 + $0x168] sm:$0xff]  ;;  %v54_v42 = vld [vmem:[%s721_s0 + $0x170] sm:$0xff] }
  0x19   :  { %v139_v52 = vadd.f32 %v138_v44, %v137_v36  ;;  %v146_v53 = vadd.f32 %v145_v45, %v144_v37  ;;  %v159_v54 = vrot.slane %v158_v46, 2  ;;  %v166_v55 = vrot.slane %v165_v47, 2 }
  0x1a   :  { %v133_v56 = vrot.slane %v132_v48, 1  ;;  %v153_v57 = vadd.f32 %v152_v49, %v151_v41  ;;  %v173_v58 = vrot.slane %v172_v50, 2  ;;  %v179_v59 = vadd.f32 %v178_v51, %v177_v43  ;;  %v55_v43 = vld [vmem:[%s721_s0 + $0x178] sm:$0xff] }
  0x1b   :  { %v140_v0 = vrot.slane %v139_v52, 1  ;;  %v147_v1 = vrot.slane %v146_v53, 1  ;;  %v160_v2 = vadd.f32 %v159_v54, %v158_v46  ;;  %v167_v3 = vadd.f32 %v166_v55, %v165_v47 }
  0x1c   :  { %v547_v9 = vadd.f32 %v133_v56, %v132_v48  ;;  %v154_v10 = vrot.slane %v153_v57, 1  ;;  %v174_v11 = vadd.f32 %v173_v58, %v172_v50  ;;  %v180_v13 = vrot.slane %v179_v59, 2 }
  0x1d   :  { %v558_v17 = vadd.f32 %v140_v0, %v139_v52  ;;  %v560_v20 = vadd.f32 %v147_v1, %v146_v53  ;;  %v161_v21 = vrot.slane %v160_v2, 1  ;;  %v168_v23 = vrot.slane %v167_v3, 1 }
  0x1e   :  { %v571_v27 = vadd.f32 %v154_v10, %v153_v57  ;;  %v175_v28 = vrot.slane %v174_v11, 1  ;;  %v181_v29 = vadd.f32 %v180_v13, %v179_v59  ;;  %v184_v30 = vadd.f32 %v41_v61, %v40_v60 }
  0x1f   :  { %v579_v34 = vadd.f32 %v161_v21, %v160_v2  ;;  %v581_v35 = vadd.f32 %v168_v23, %v167_v3  ;;  %v191_v36 = vadd.f32 %v43_v4, %v42_v63  ;;  %v198_v37 = vadd.f32 %v45_v8, %v44_v7  ;;  %v56_v21 = vld [vmem:[%s721_s0 + $0x180] sm:$0xff]  ;;  %v57_v23 = vld [vmem:[%s721_s0 + $0x188] sm:$0xff] }
  0x20   :  { %v583_v38 = vadd.f32 %v175_v28, %v174_v11  ;;  %v182_v39 = vrot.slane %v181_v29, 1  ;;  %v185_v40 = vrot.slane %v184_v30, 4  ;;  %v205_v41 = vadd.f32 %v47_v15, %v46_v14 }
  0x21   :  { %v192_v44 = vrot.slane %v191_v36, 4  ;;  %v199_v45 = vrot.slane %v198_v37, 4  ;;  %v212_v46 = vadd.f32 %v49_v24, %v48_v16  ;;  %v219_v47 = vadd.f32 %v51_v26, %v50_v25  ;;  %v58_v24 = vld [vmem:[%s721_s0 + $0x190] sm:$0xff] }
  0x22   :  { %v591_v48 = vadd.f32 %v182_v39, %v181_v29  ;;  %v186_v49 = vadd.f32 %v185_v40, %v184_v30  ;;  %v206_v50 = vrot.slane %v205_v41, 4  ;;  %v226_v51 = vadd.f32 %v53_v33, %v52_v31  ;;  %v59_v30 = vld [vmem:[%s721_s0 + $0x198] sm:$0xff]  ;;  %v60_v31 = vld [vmem:[%s721_s0 + $0x1a0] sm:$0xff]  ;;  %v61_v33 = vld [vmem:[%s721_s0 + $0x1a8] sm:$0xff] }
  0x23   :  { %v193_v52 = vadd.f32 %v192_v44, %v191_v36  ;;  %v200_v53 = vadd.f32 %v199_v45, %v198_v37  ;;  %v213_v54 = vrot.slane %v212_v46, 4  ;;  %v220_v55 = vrot.slane %v219_v47, 4 }
  0x24   :  { %v187_v56 = vrot.slane %v186_v49, 2  ;;  %v207_v57 = vadd.f32 %v206_v50, %v205_v41  ;;  %v227_v58 = vrot.slane %v226_v51, 4  ;;  %v233_v59 = vadd.f32 %v55_v43, %v54_v42  ;;  %v62_v41 = vld [vmem:[%s721_s0 + $0x1b0] sm:$0xff]  ;;  %v63_v42 = vld [vmem:[%s721_s0 + $0x1b8] sm:$0xff]  ;;  %v64_v43 = vld [vmem:[%s721_s0 + $0x1c0] sm:$0xff] }
  0x25   :  { %v194_v60 = vrot.slane %v193_v52, 2  ;;  %v201_v61 = vrot.slane %v200_v53, 2  ;;  %v214_v63 = vadd.f32 %v213_v54, %v212_v46  ;;  %v221_v0 = vadd.f32 %v220_v55, %v219_v47  ;;  %v66_v50 = vld [vmem:[%s721_s0 + $0x1d0] sm:$0xff] }
  0x26   :  { %v188_v1 = vadd.f32 %v187_v56, %v186_v49  ;;  %v208_v2 = vrot.slane %v207_v57, 2  ;;  %v228_v3 = vadd.f32 %v227_v58, %v226_v51  ;;  %v234_v4 = vrot.slane %v233_v59, 4  ;;  %v65_v49 = vld [vmem:[%s721_s0 + $0x1c8] sm:$0xff]  ;;  %v67_v51 = vld [vmem:[%s721_s0 + $0x1d8] sm:$0xff]  ;;  %v68_v56 = vld [vmem:[%s721_s0 + $0x1e0] sm:$0xff] }
  0x27   :  { %v195_v7 = vadd.f32 %v194_v60, %v193_v52  ;;  %v202_v8 = vadd.f32 %v201_v61, %v200_v53  ;;  %v215_v10 = vrot.slane %v214_v63, 2  ;;  %v222_v11 = vrot.slane %v221_v0, 2 }
  0x28   :  { %v189_v13 = vrot.slane %v188_v1, 1  ;;  %v209_v14 = vadd.f32 %v208_v2, %v207_v57  ;;  %v229_v15 = vrot.slane %v228_v3, 2  ;;  %v235_v16 = vadd.f32 %v234_v4, %v233_v59  ;;  %v69_v57 = vld [vmem:[%s721_s0 + $0x1e8] sm:$0xff]  ;;  %v71_v4 = vld [vmem:[%s721_s0 + $0x1f8] sm:$0xff] }
  0x29   :  { %v196_v25 = vrot.slane %v195_v7, 1  ;;  %v203_v26 = vrot.slane %v202_v8, 1  ;;  %v216_v28 = vadd.f32 %v215_v10, %v214_v63  ;;  %v223_v29 = vadd.f32 %v222_v11, %v221_v0 }
  0x2a   :  { %v611_v36 = vadd.f32 %v189_v13, %v188_v1  ;;  %v210_v37 = vrot.slane %v209_v14, 1  ;;  %v230_v39 = vadd.f32 %v229_v15, %v228_v3  ;;  %v236_v40 = vrot.slane %v235_v16, 2  ;;  %v70_v3 = vld [vmem:[%s721_s0 + $0x1f0] sm:$0xff] }
  0x2b   :  { %v622_v44 = vadd.f32 %v196_v25, %v195_v7  ;;  %v624_v45 = vadd.f32 %v203_v26, %v202_v8  ;;  %v217_v46 = vrot.slane %v216_v28, 1  ;;  %v224_v47 = vrot.slane %v223_v29, 1 }
  0x2c   :  { %v635_v52 = vadd.f32 %v210_v37, %v209_v14  ;;  %v231_v53 = vrot.slane %v230_v39, 1  ;;  %v237_v54 = vadd.f32 %v236_v40, %v235_v16  ;;  %v240_v55 = vadd.f32 %v57_v23, %v56_v21 }
  0x2d   :  { %v643_v58 = vadd.f32 %v217_v46, %v216_v28  ;;  %v645_v59 = vadd.f32 %v224_v47, %v223_v29  ;;  %v247_v60 = vadd.f32 %v59_v30, %v58_v24  ;;  %v254_v61 = vadd.f32 %v61_v33, %v60_v31 }
  0x2e   :  { %v647_v63 = vadd.f32 %v231_v53, %v230_v39  ;;  %v238_v0 = vrot.slane %v237_v54, 1  ;;  %v241_v1 = vrot.slane %v240_v55, 4  ;;  %v261_v2 = vadd.f32 %v63_v42, %v62_v41 }
  0x2f   :  { %v248_v7 = vrot.slane %v247_v60, 4  ;;  %v255_v8 = vrot.slane %v254_v61, 4  ;;  %v268_v10 = vadd.f32 %v65_v49, %v64_v43  ;;  %v275_v11 = vadd.f32 %v67_v51, %v66_v50 }
  0x30   :  { %v655_v13 = vadd.f32 %v238_v0, %v237_v54  ;;  %v242_v14 = vadd.f32 %v241_v1, %v240_v55  ;;  %v262_v15 = vrot.slane %v261_v2, 4  ;;  %v282_v16 = vadd.f32 %v69_v57, %v68_v56 }
  0x31   :  { %v249_v21 = vadd.f32 %v248_v7, %v247_v60  ;;  %v256_v23 = vadd.f32 %v255_v8, %v254_v61  ;;  %v269_v24 = vrot.slane %v268_v10, 4  ;;  %v276_v25 = vrot.slane %v275_v11, 4 }
  0x32   :  { %v243_v26 = vrot.slane %v242_v14, 2  ;;  %v263_v28 = vadd.f32 %v262_v15, %v261_v2  ;;  %v283_v29 = vrot.slane %v282_v16, 4  ;;  %v289_v30 = vadd.f32 %v71_v4, %v70_v3 }
  0x33   :  { %v250_v31 = vrot.slane %v249_v21, 2  ;;  %v257_v33 = vrot.slane %v256_v23, 2  ;;  %v270_v37 = vadd.f32 %v269_v24, %v268_v10  ;;  %v277_v39 = vadd.f32 %v276_v25, %v275_v11 }
  0x34   :  { %v244_v40 = vadd.f32 %v243_v26, %v242_v14  ;;  %v264_v41 = vrot.slane %v263_v28, 2  ;;  %v284_v42 = vadd.f32 %v283_v29, %v282_v16  ;;  %v290_v43 = vrot.slane %v289_v30, 4 }
  0x35   :  { %v251_v46 = vadd.f32 %v250_v31, %v249_v21  ;;  %v258_v47 = vadd.f32 %v257_v33, %v256_v23  ;;  %v271_v49 = vrot.slane %v270_v37, 2  ;;  %v278_v50 = vrot.slane %v277_v39, 2 }
  0x36   :  { %v245_v51 = vrot.slane %v244_v40, 1  ;;  %v265_v53 = vadd.f32 %v264_v41, %v263_v28  ;;  %v285_v54 = vrot.slane %v284_v42, 2  ;;  %v291_v55 = vadd.f32 %v290_v43, %v289_v30 }
  0x37   :  { %v252_v56 = vrot.slane %v251_v46, 1  ;;  %v259_v57 = vrot.slane %v258_v47, 1  ;;  %v272_v60 = vadd.f32 %v271_v49, %v270_v37  ;;  %v279_v61 = vadd.f32 %v278_v50, %v277_v39 }
  0x38   :  { %v246_v0 = vadd.f32 %v245_v51, %v244_v40  ;;  %v266_v1 = vrot.slane %v265_v53, 1  ;;  %v286_v2 = vadd.f32 %v285_v54, %v284_v42  ;;  %v292_v3 = vrot.slane %v291_v55, 2 }
  0x39   :  { %v253_v4 = vadd.f32 %v252_v56, %v251_v46  ;;  %v260_v7 = vadd.f32 %v259_v57, %v258_v47  ;;  %v273_v8 = vrot.slane %v272_v60, 1  ;;  %v280_v10 = vrot.slane %v279_v61, 1 }
  0x3a   :  { %v267_v11 = vadd.f32 %v266_v1, %v265_v53  ;;  %v287_v14 = vrot.slane %v286_v2, 1  ;;  %v293_v15 = vadd.f32 %v292_v3, %v291_v55  ;;  %v296_v16 = vmul.f32 0.0625, %v483_v62 }
  0x3b   :  { %v274_v21 = vadd.f32 %v273_v8, %v272_v60  ;;  %v281_v23 = vadd.f32 %v280_v10, %v279_v61  ;;  %v297_v24 = vmul.f32 0.0625, %v494_v5  ;;  %v298_v25 = vmul.f32 0.0625, %v496_v6 }
  0x3c   :  { %v288_v26 = vadd.f32 %v287_v14, %v286_v2  ;;  %v294_v28 = vrot.slane %v293_v15, 1  ;;  %v299_v29 = vmul.f32 0.0625, %v507_v12  ;;  %v300_v30 = vmul.f32 0.0625, %v515_v18 }
  0x3d   :  { %v301_v31 = vmul.f32 0.0625, %v517_v19  ;;  %v302_v33 = vmul.f32 0.0625, %v519_v22  ;;  %v303_v62 = vmul.f32 0.0625, %v527_v32  ;;  %v304_v37 = vmul.f32 0.0625, %v547_v9 }
  0x3e   :  { %v295_v5 = vadd.f32 %v294_v28, %v293_v15  ;;  %v305_v6 = vmul.f32 0.0625, %v558_v17  ;;  %v306_v39 = vmul.f32 0.0625, %v560_v20  ;;  %v307_v40 = vmul.f32 0.0625, %v571_v27 }
  0x3f   :  { %v308_v12 = vmul.f32 0.0625, %v579_v34  ;;  %v309_v18 = vmul.f32 0.0625, %v581_v35  ;;  %v310_v19 = vmul.f32 0.0625, %v583_v38  ;;  %v311_v22 = vmul.f32 0.0625, %v591_v48 }
  0x40   :  { %v312_v32 = vmul.f32 0.0625, %v611_v36  ;;  %v313_v9 = vmul.f32 0.0625, %v622_v44  ;;  %v314_v17 = vmul.f32 0.0625, %v624_v45  ;;  %v315_v20 = vmul.f32 0.0625, %v635_v52 }
  0x41   :  { %v316_v27 = vmul.f32 0.0625, %v643_v58  ;;  %v317_v41 = vmul.f32 0.0625, %v645_v59  ;;  %v318_v34 = vmul.f32 0.0625, %v647_v63  ;;  %v319_v35 = vmul.f32 0.0625, %v655_v13 }
  0x42   :  { %v320_v38 = vmul.f32 0.0625, %v246_v0  ;;  %v321_v42 = vmul.f32 0.0625, %v253_v4  ;;  %v322_v48 = vmul.f32 0.0625, %v260_v7  ;;  %v323_v43 = vmul.f32 0.0625, %v267_v11 }
  0x43   :  { %v324_v46 = vmul.f32 0.0625, %v274_v21  ;;  %v325_v36 = vmul.f32 0.0625, %v281_v23  ;;  %v326_v47 = vmul.f32 0.0625, %v288_v26  ;;  %v327_v44 = vmul.f32 0.0625, %v295_v5 }
  0x44   :  { %v361_v45 = vsel %vm360_vm0, %v297_v24, %v296_v16  ;;  %v374_v52 = vsel %vm360_vm0, %v305_v6, %v304_v37  ;;  %v381_v58 = vsel %vm360_vm0, %v313_v9, %v312_v32  ;;  %v388_v59 = vsel %vm360_vm0, %v321_v42, %v320_v38 }
  0x45   :  { %v363_v63 = vsel %vm362_vm1, %v298_v25, %v361_v45  ;;  %v375_v13 = vsel %vm362_vm1, %v306_v39, %v374_v52  ;;  %v382_v49 = vsel %vm362_vm1, %v314_v17, %v381_v58  ;;  %v389_v50 = vsel %vm362_vm1, %v322_v48, %v388_v59 }
  0x46   :  { %v365_v51 = vsel %vm364_vm2, %v299_v29, %v363_v63  ;;  %v376_v53 = vsel %vm364_vm2, %v307_v40, %v375_v13  ;;  %v383_v54 = vsel %vm364_vm2, %v315_v20, %v382_v49  ;;  %v390_v55 = vsel %vm364_vm2, %v323_v43, %v389_v50 }
  0x47   :  { %v367_v56 = vsel %vm366_vm3, %v300_v30, %v365_v51  ;;  %v377_v57 = vsel %vm366_vm3, %v308_v12, %v376_v53  ;;  %v384_v60 = vsel %vm366_vm3, %v316_v27, %v383_v54  ;;  %v391_v61 = vsel %vm366_vm3, %v324_v46, %v390_v55 }
  0x48   :  { %v369_v0 = vsel %vm368_vm4, %v301_v31, %v367_v56  ;;  %v378_v1 = vsel %vm368_vm4, %v309_v18, %v377_v57  ;;  %v385_v2 = vsel %vm368_vm4, %v317_v41, %v384_v60  ;;  %v392_v3 = vsel %vm368_vm4, %v325_v36, %v391_v61 }
  0x49   :  { %v371_v4 = vsel %vm370_vm5, %v302_v33, %v369_v0  ;;  %v379_v7 = vsel %vm370_vm5, %v310_v19, %v378_v1  ;;  %v386_v8 = vsel %vm370_vm5, %v318_v34, %v385_v2  ;;  %v393_v10 = vsel %vm370_vm5, %v326_v47, %v392_v3 }
  0x4a   :  { %v373_v11 = vsel %vm372_vm6, %v303_v62, %v371_v4  ;;  %v380_v14 = vsel %vm372_vm6, %v311_v22, %v379_v7  ;;  %v387_v15 = vsel %vm372_vm6, %v319_v35, %v386_v8  ;;  %v394_v16 = vsel %vm372_vm6, %v327_v44, %v393_v10 }
  0x4b   :  { %399 = vst [vmem:[%s722_s1] sm:$0xff] %v373_v11  ;;  %400 = vst [vmem:[%s722_s1 + $0x8] sm:$0xff] %v380_v14 }
  0x4c   :  { %401 = vst [vmem:[%s722_s1 + $0x10] sm:$0xff] %v387_v15  ;;  %402 = vst [vmem:[%s722_s1 + $0x18] sm:$0xff] %v394_v16 }

// kernel: inception_aux_forward.5
= control target key start
LH: loop header
LB: loop body
LE: loop exit
PB: predicated region body
PF: predicated region fallthrough
CT: control target
= control target key end

     0   :  { %8 = vsyncpa [#allocation4], 0  ;;  %s281_s12 = smov [#allocation3]   ;;  %s347_s0 = inlined_call_operand.vmem [shape: bf16[32,128], index: 0, kind: input, shape index: {}]   ;;  %s348_s1 = inlined_call_operand.vmem [shape: bf16[128,128], index: 1, kind: input, shape index: {}]   ;;  %s349_s2 = inlined_call_operand.hbm [shape: f32[1,128], index: 2, kind: input, shape index: {}]   ;;  %s350_s3 = inlined_call_operand.vmem [shape: f32[32,128], index: 3, kind: output, shape index: {}]  }
   0x1   :  { %s19_s13 = sshll.u32 %s281_s12, 4  ;;  %s20_s13 = int_to_ptr.vmem [resolvable:$true] %s19_s13 }
   0x2   :  { %s267_s14 = scalar_lea.vmem %s20_s13, 16  ;;  %s271_s15 = scalar_lea.vmem %s20_s13, 32 }
   0x3   :  { %p268_p0 = scmp.ne.s32.totalorder %s20_s13, %s267_s14  ;;  %p272_p1 = scmp.lt.s32.totalorder %s20_s13, %s20_s13 }
   0x4   :  { %p273_p2 = scmp.lt.s32.totalorder %s271_s15, %s267_s14 }
   0x6   :  { %p274_p3 = por %p273_p2, %p272_p1 }
   0x8   :  { %p275_p4 = pnand %p274_p3, %p268_p0 }
   0xa   :  { %278 = shalt.err (!%p275_p4)
}
   0xb   :  { %22 = dma.hbm_to_vmem [thread:$0]  %s349_s2, 16, %s20_s13, [#allocation4]  }
   0xc   :  { %279 = dma.done.wait [#allocation4], 16  }
   0xd   :  { %280 = vsyncadd [#allocation4], 4294967280  ;;  %v249_v0 = vld [vmem:[%s348_s1 + $0x38] sm:$0xff]   ;;  %v250_v1 = vld [vmem:[%s348_s1 + $0x30] sm:$0xff]  }
   0xe   :  { %228 = vmatprep.subr.bf16.mxu0 %v249_v0  ;;  %v251_v2 = vld [vmem:[%s348_s1 + $0x28] sm:$0xff]   ;;  %v252_v3 = vld [vmem:[%s348_s1 + $0x20] sm:$0xff]   ;;  %v253_v5 = vld [vmem:[%s348_s1 + $0x18] sm:$0xff]  }
   0xf   :  { %229 = vmatpush3.bf16.msra.mxu0 %v249_v0  ;;  %v257_v4 = vld [vmem:[%s347_s0] sm:$0xff]   ;;  %v254_v6 = vld [vmem:[%s348_s1 + $0x10] sm:$0xff]   ;;  %v255_v7 = vld [vmem:[%s348_s1 + $0x8] sm:$0xff]  }
  0x10   :  { %230 = vmatprep.subr.bf16.mxu0 %v250_v1  ;;  %244 = vmatprep.mubr.bf16.mxu0 %v257_v4  ;;  %v256_v8 = vld [vmem:[%s348_s1] sm:$0xff]   ;;  %v258_v9 = vld [vmem:[%s347_s0 + $0x8] sm:$0xff]  }
  0x11   :  { %v217_v10 = vld [vmem:[#allocation3] ss:$0 sm:$0xff] }
  0x13   :  { %231 = vmatpush3.bf16.msra.mxu0 %v250_v1 }
  0x14   :  { %232 = vmatprep.subr.bf16.mxu0 %v251_v2 }
  0x17   :  { %233 = vmatpush3.bf16.msra.mxu0 %v251_v2 }
  0x18   :  { %234 = vmatprep.subr.bf16.mxu0 %v252_v3 }
  0x1b   :  { %235 = vmatpush3.bf16.msra.mxu0 %v252_v3 }
  0x1c   :  { %236 = vmatprep.subr.bf16.mxu0 %v253_v5 }
  0x1f   :  { %237 = vmatpush3.bf16.msra.mxu0 %v253_v5 }
  0x20   :  { %238 = vmatprep.subr.bf16.mxu0 %v254_v6 }
  0x23   :  { %239 = vmatpush3.bf16.msra.mxu0 %v254_v6 }
  0x24   :  { %240 = vmatprep.subr.bf16.mxu0 %v255_v7 }
  0x27   :  { %241 = vmatpush3.bf16.msra.mxu0 %v255_v7 }
  0x28   :  { %242 = vmatprep.subr.bf16.mxu0 %v256_v8 }
  0x2b   :  { %243 = vmatpush3.bf16.msra.mxu0 %v256_v8 }
  0x2e   :  { %245 = vmatmul.mubr.bf16.vlgmr.msra.gmra.mxu0 %v258_v9 }
  0xee   :  { %v246_v11 = vpop.f32.mrf.mxu0 }
  0xef   :  { %v192_v12 = vadd.f32 %v246_v11, %v217_v10 }
  0xf0   :  { %v153_v13 = vpop.f32.mrf.mxu0 }
  0xf1   :  { %v196_v14 = vmax.f32 %v192_v12, 0.0  ;;  %v190_v15 = vadd.f32 %v217_v10, %v153_v13 }
  0xf2   :  { %v247_v16 = vpop.f32.mrf.mxu0 }
  0xf3   :  { %200 = vst [vmem:[%s350_s3 + $0x10] sm:$0xff] %v196_v14  ;;  %v194_v17 = vmax.f32 %v190_v15, 0.0  ;;  %v193_v18 = vadd.f32 %v247_v16, %v217_v10 }
  0xf4   :  { %v156_v19 = vpop.f32.mrf.mxu0 }
  0xf5   :  { %198 = vst [vmem:[%s350_s3] sm:$0xff] %v194_v17  ;;  %v197_v20 = vmax.f32 %v193_v18, 0.0  ;;  %v191_v21 = vadd.f32 %v217_v10, %v156_v19 }
  0xf7   :  { %201 = vst [vmem:[%s350_s3 + $0x18] sm:$0xff] %v197_v20  ;;  %v195_v22 = vmax.f32 %v191_v21, 0.0 }
  0xf9   :  { %199 = vst [vmem:[%s350_s3 + $0x8] sm:$0xff] %v195_v22 }
  0xfa   :  { %206 = vsyncpa [#allocation4], 1 }

// kernel: inception_aux_forward.6
= control target key start
LH: loop header
LB: loop body
LE: loop exit
PB: predicated region body
PF: predicated region fallthrough
CT: control target
= control target key end

     0   :  { %s1735_s0 = inlined_call_operand.vmem [shape: bf16[8,2048], index: 0, kind: input, shape index: {}]   ;;  %s1736_s1 = inlined_call_operand.hbm [shape: bf16[2048,1024], index: 1, kind: input, shape index: {}]   ;;  %s1737_s2 = inlined_call_operand.hbm [shape: f32[1,1024], index: 2, kind: input, shape index: {}]   ;;  %s1738_s3 = inlined_call_operand.vmem [shape: f32[8,1024], index: 3, kind: output, shape index: {}]  }
   0x1   :  { %1741 = sst [smem:[#allocation11_spill]] %s1736_s1 }
   0x2   :  { %8 = vsyncpa [#allocation4], 0 }
   0x3   :  { %10 = vsyncpa [#allocation4 + $0x1], 0 }
   0x4   :  { %11 = vsyncpa [#allocation6], 0 }
   0x5   :  { %13 = vsyncpa [#allocation6 + $0x1], 0  ;;  %s1438_s12 = smov 0   ;;  %s1440_s13 = smov 0  }
   0x6   :  { %s1442_s14 = smov 0   ;;  %s1444_s15 = smov 0  }
   0x7   :  { %s1446_s16 = smov 0   ;;  %s1448_s17 = smov 0  }
   0x8   :  { %s1450_s18 = smov 0   ;;  %s1452_s19 = smov 0  }
   0x9   :  { %s1454_s20 = smov 0   ;;  %s1456_s21 = smov 0  }
   0xa   :  { %s1458_s22 = smov 0  }
   0xb LB: > { %s31_s23 = sadd.s32 1, %s1402_s20  ;;  %p82_p1 = scmp.ne.s32.totalorder %s1390_s17, %s1386_s16  ;;  %s1410_s22 = sphi %s1458_s22, %s19_s22   ;;  %s1406_s21 = sphi %s1456_s21, %s1766_s21   ;;  %s1402_s20 = sphi %s1454_s20, %s1765_s20   ;;  %s1398_s19 = sphi %s1452_s19, %s1764_s19   ;;  %s1394_s18 = sphi %s1450_s18, %s1763_s18   ;;  %s1390_s17 = sphi %s1448_s17, %s1762_s17   ;;  %s1386_s16 = sphi %s1446_s16, %s1761_s16   ;;  %s1382_s15 = sphi %s1444_s15, %s1760_s15   ;;  %s1378_s14 = sphi %s1442_s14, %s1759_s14   ;;  %s1374_s13 = sphi %s1440_s13, %s1758_s13   ;;  %s1370_s12 = sphi %s1438_s12, %s1757_s12  }
   0xc   : > { %p1495_p0 = scmp.ge.s32.totalorder %s31_s23, 4  ;;  %p83_p2 = scmp.eq.s32.totalorder %s1410_s22, 0 }
   0xd   : > { %p1067_p4 = scmp.lt.s32.totalorder %s1410_s22, 16  ;;  %s179_s27 = sand.u32 1, %s1390_s17  }
   0xe   : > { %s1768_s23 = smov (%p1495_p0, %s31_s23), 0  ;;  %p84_p3 = por %p83_p2, %p82_p1 }
   0xf   : > { %1743 = sst [smem:[#allocation9_spill]] %s1768_s23  ;;  %s967_s28 = sshll.u32 %s179_s27, 9 }
  0x10   : > { %s969_s29 = sshll.u32 %s1406_s21, 1  ;;  %s1054_s30 = sshll.u32 %s1402_s20, 9 }
  0x11   : > { %s183_s4 = scalar_lea.vmem [#allocation3], %s967_s28  ;;  %s190_s6 = sadd.s32 %s1054_s30, %s969_s29 }
  0x12   : > { %s193_s5 = sshll.u32 %s183_s4, 4  ;;  %s971_s7 = sshll.u32 %s190_s6, 6  ;;  %s194_s5 = int_to_ptr.vmem [resolvable:$true] %s193_s5 }
  0x13   : > { %p1516_p5 = pnand %p1067_p4, %p84_p3  ;;  %s1745_s1 = sld [smem:[#allocation11_spill]] }
  0x14   : > { %p975_p6 = scmp.ge.s32.totalorder %s1410_s22, 1  ;;  %s180_s24 = scalar_lea.sflag [#allocation4], %s179_s27 }
  0x15   : > { %p1262_p7 = pneg %p1516_p5  ;;  %s1273_s26 = scalar_lea.vmem %s194_s5, 8192 }
  0x16   : > { %p1274_p8 = scmp.ne.s32.totalorder %s194_s5, %s1273_s26  ;;  %s1412_s28 = smov [#allocation3]  }
  0x17   : > { %s1278_s29 = sshll.u32 %s1412_s28, 4  ;;  %s1279_s29 = int_to_ptr.vmem [resolvable:$false] %s1278_s29 }
  0x18   : > { %p1276_p9 = pnand %p1274_p8, %p1262_p7  ;;  %s1280_s30 = scalar_lea.vmem %s1279_s29, 16384 }
  0x19   : > { %s192_s11 = scalar_lea.hbm %s1745_s1, %s971_s7  ;;  %p1281_p11 = scmp.lt.s32.totalorder %s194_s5, %s1279_s29 }
  0x1a   : > { %p1277_p10 = pneg %p1276_p9  ;;  %p1282_p12 = scmp.lt.s32.totalorder %s1280_s30, %s1273_s26 }
  0x1c   : > { %p1283_p13 = por %p1282_p12, %p1281_p11 }
  0x1e   : > { %p1284_p1 = pnand %p1283_p13, %p1277_p10 }
  0x20   : > { %1287 = shalt.err (!%p1284_p1)
}
  0x21   : > { %s1413_s4 = smov 512   ;;  %s1414_s27 = smov 128  }
  0x22   : > { %s1415_s26 = smov 8   ;;  %p220_p3 = scmp.lt.s32.totalorder %s1410_s22, 17 }
  0x23   : > { %1063 = dma.hbm_to_vmem [thread:$0]  (!%p1516_p5), %s192_s11, 8192, %s194_s5, %s180_s24, %s1413_s4, %s1414_s27, %s1415_s26  }
  0x24   : > { %p1531_p7 = pnand %p975_p6, %p220_p3  ;;  %s963_s7 = sadd.s32 4294967295, %s1410_s22  }
  0x25   : > { %s34_s9 = sadd.s32 1, %s1406_s21  ;;  %p88_p8 = scmp.ne.s32.totalorder %s1386_s16, %s1382_s15 }
  0x26   : > { %s1770_s9 = smov (!%p1495_p0, %s34_s9), %s1406_s21  ;;  %p1542_p9 = scmp.eq.s32.totalorder %s963_s7, 0 }
  0x27   : > { %p36_p5 = scmp.ge.s32.totalorder %s1770_s9, 4  ;;  %s101_s24 = sadd.s32 1, %s1378_s14 }
  0x28   : > { %p1549_p6 = por %p1542_p9, %p88_p8  ;;  %p108_p10 = scmp.ne.s32.totalorder %s1378_s14, %s1374_s13 }
  0x29   : > { %s1772_s9 = smov (%p36_p5, %s1770_s9), 0  ;;  %p114_p11 = scmp.ne.s32.totalorder %s1374_s13, %s1370_s12 }
  0x2a   : > { %1749 = sst [smem:[#allocation10_spill]] %s1772_s9  ;;  %p1559_p0 = por %p108_p10, %p83_p2 }
  0x2b   : > { %s71_s25 = ssub.s32 %s1406_s21, %s1772_s9  ;;  %s203_s10 = sand.u32 1, %s1378_s14  }
  0x2c   : > { %s1751_s11 = ssub.s32 %s1402_s20, %s1768_s23  ;;  %p99_p12 = scmp.eq.s32.totalorder %s71_s25, 0 }
  0x2d   : > { %s72_s28 = sor.u32 %s71_s25, %s1751_s11  ;;  %p1573_p1 = por %p114_p11, %p1542_p9 }
  0x2e   : > { %p73_p13 = scmp.eq.s32.totalorder %s72_s28, 0  ;;  %s1753_s4 = sadd.s32 1, %s1390_s17 }
  0x2f   : > { %s1578_s30 = scalar_select %p99_p12, %s1378_s14, %s101_s24  }
  0x30   : > { %s1583_s27 = scalar_select %p73_p13, %s1390_s17, %s1753_s4  }
  0x31   : > { %s972_s26 = sshll.u32 %s203_s10, 1  ;;  %s1055_s7 = sshll.u32 %s1406_s21, 5 }
  0x32   : > { %s213_s9 = scalar_lea.hbm %s1737_s2, %s1055_s7  ;;  %s207_s23 = scalar_lea.vmem [#allocation5], %s972_s26 }
  0x33   : > { %s215_s11 = sshll.u32 %s207_s23, 4  ;;  %p1593_p2 = pnand %p1067_p4, %p1559_p0  ;;  %s216_s11 = int_to_ptr.vmem [resolvable:$true] %s215_s11 }
  0x34   : > { %s204_s24 = scalar_lea.sflag [#allocation6], %s203_s10  ;;  %s1301_s25 = scalar_lea.vmem %s216_s11, 32 }
  0x35   : > { %p1290_p3 = pneg %p1593_p2  ;;  %p1302_p8 = scmp.ne.s32.totalorder %s216_s11, %s1301_s25 }
  0x36   : > { %s1416_s28 = smov [#allocation5]  }
  0x37   : > { %p1304_p9 = pnand %p1302_p8, %p1290_p3  ;;  %s1306_s1 = sshll.u32 %s1416_s28, 4  ;;  %s1307_s1 = int_to_ptr.vmem [resolvable:$false] %s1306_s1 }
  0x38   : > { %s1308_s4 = scalar_lea.vmem %s1307_s1, 64  ;;  %p1309_p10 = scmp.lt.s32.totalorder %s216_s11, %s1307_s1 }
  0x39   : > { %p1305_p5 = pneg %p1304_p9  ;;  %p1310_p11 = scmp.lt.s32.totalorder %s1308_s4, %s1301_s25 }
  0x3b   : > { %p1311_p12 = por %p1310_p11, %p1309_p10 }
  0x3d   : > { %p1312_p13 = pnand %p1311_p12, %p1305_p5 }
  0x3f   : > { %1315 = shalt.err (!%p1312_p13)
}
  0x40   : > { %1066 = dma.hbm_to_vmem [thread:$0]  (!%p1593_p2), %s213_s9, 32, %s216_s11, %s204_s24  }
  0x41   : > { %224 = sbr.rel (%p1531_p7) target bundleno = 367 (0x16f), region = 32  ;;  %s226_s23 = sand.u32 (!%p1531_p7), 1, %s1386_s16  }
  0x42   : > { %s976_s15 = sshll.u32 (!%p1531_p7), %s226_s23, 9  ;;  %s227_s10 = scalar_lea.sflag (!%p1531_p7), [#allocation4], %s226_s23 }
  0x43   : > { %s1604_s26 = scalar_lea.vmem (!%p1531_p7), [#allocation3], %s976_s15 }
  0x46   : > { %1361 = dma.done.wait (%p1549_p6), %s227_s10, 8192  }
  0x47   : > { %1363 = vsyncadd (%p1549_p6), %s227_s10, 4294959104  ;;  %s235_s7 = sand.u32 1, %s1374_s13  }
  0x48   : > { %s1611_s12 = sshll.u32 %s235_s7, 1  ;;  %s236_s6 = scalar_lea.sflag [#allocation6], %s235_s7 }
  0x49   : > { %s239_s9 = scalar_lea.vmem [#allocation5], %s1611_s12 }
  0x4a   : > { %1365 = dma.done.wait (%p1573_p1), %s236_s6, 32  }
  0x4b   : > { %1367 = vsyncadd (%p1573_p1), %s236_s6, 4294967264  ;;  %s978_s11 = sshll.u32 %s1394_s18, 2  ;;  %s980_s8 = sshll.u32 %s1398_s19, 1 }
  0x4c   : > { %p283_p4 = scmp.lt.s32.totalorder %s978_s11, 15  ;;  %p296_p7 = scmp.lt.s32.totalorder %s980_s8, 7 }
  0x4d   : > { %p982_p6 = scmp.ne.s32.totalorder %s1394_s18, 0 }
  0x4e   : > { %s1774_s11 = smov (!%p283_p4, %s978_s11), 15  ;;  %s1776_s8 = smov (!%p296_p7, %s980_s8), 7 }
  0x4f   : > { %s979_s5 = sshll.u32 %s1774_s11, 2  ;;  %s981_s1 = sshll.u32 %s1776_s8, 3 }
  0x50   : > { %s1623_s28 = scalar_lea.vmem %s1735_s0, %s979_s5  ;;  %s1628_s29 = scalar_lea.vmem %s1738_s3, %s981_s1 }
  0x51   : > { %306 = sbr.rel (%p982_p6) target bundleno = 88 (0x58), region = 44 }
  0x56   : > { %v1417_v0 = vmov 0.0  }
  0x57   : > { %307 = vst [vmem:[#allocation2] sm:$0xff] %v1417_v0  ;;  %308 = vst [vmem:[#allocation2 + $0x8] sm:$0xff] %v1417_v0 }
  0x58 PF: > { %v1160_v1 = vld [vmem:[%s1604_s26 + $0x74] ss:$8 sps:$4 sm:$0xff]   ;;  %v1164_v3 = vld [vmem:[%s1604_s26 + $0x70] ss:$8 sps:$4 sm:$0xff]   ;;  %v1166_v5 = vld [vmem:[%s1604_s26 + $0x64] ss:$8 sps:$4 sm:$0xff]  }
  0x59   : > { %v1162_v2 = vld [vmem:[%s1604_s26 + $0x174] ss:$8 sps:$4 sm:$0xff]   ;;  %711 = vmatprep.subr.bf16.mxu0 %v1160_v1  ;;  %v1165_v4 = vld [vmem:[%s1604_s26 + $0x170] ss:$8 sps:$4 sm:$0xff]   ;;  %v1168_v6 = vld [vmem:[%s1604_s26 + $0x164] ss:$8 sps:$4 sm:$0xff]  }
  0x5a   : > { %752 = vmatprep.subr.bf16.mxu1 %v1162_v2  ;;  %712 = vmatpush1.bf16.msra.mxu0 %v1164_v3  ;;  %v1170_v7 = vld [vmem:[%s1604_s26 + $0x60] ss:$8 sps:$4 sm:$0xff]   ;;  %v1172_v9 = vld [vmem:[%s1604_s26 + $0x54] ss:$8 sps:$4 sm:$0xff]   ;;  %v1176_v11 = vld [vmem:[%s1604_s26 + $0x50] ss:$8 sps:$4 sm:$0xff]  }
  0x5b   : > { %753 = vmatpush1.bf16.msra.mxu1 %v1165_v4  ;;  %713 = vmatprep.subr.bf16.mxu0 %v1166_v5  ;;  %v1171_v8 = vld [vmem:[%s1604_s26 + $0x160] ss:$8 sps:$4 sm:$0xff]   ;;  %v1174_v10 = vld [vmem:[%s1604_s26 + $0x154] ss:$8 sps:$4 sm:$0xff]   ;;  %v1177_v12 = vld [vmem:[%s1604_s26 + $0x150] ss:$8 sps:$4 sm:$0xff]  }
  0x5c   : > { %754 = vmatprep.subr.bf16.mxu1 %v1168_v6  ;;  %v1178_v13 = vld [vmem:[%s1604_s26 + $0x44] ss:$8 sps:$4 sm:$0xff]   ;;  %v1182_v15 = vld [vmem:[%s1604_s26 + $0x40] ss:$8 sps:$4 sm:$0xff]   ;;  %v1184_v17 = vld [vmem:[%s1604_s26 + $0x34] ss:$8 sps:$4 sm:$0xff]  }
  0x5d   : > { %v1180_v14 = vld [vmem:[%s1604_s26 + $0x144] ss:$8 sps:$4 sm:$0xff]   ;;  %v1183_v16 = vld [vmem:[%s1604_s26 + $0x140] ss:$8 sps:$4 sm:$0xff]   ;;  %v1186_v18 = vld [vmem:[%s1604_s26 + $0x134] ss:$8 sps:$4 sm:$0xff]  }
  0x5e   : > { %714 = vmatpush1.bf16.msra.mxu0 %v1170_v7  ;;  %v1188_v19 = vld [vmem:[%s1604_s26 + $0x30] ss:$8 sps:$4 sm:$0xff]   ;;  %v1190_v21 = vld [vmem:[%s1604_s26 + $0x24] ss:$8 sps:$4 sm:$0xff]   ;;  %v1194_v23 = vld [vmem:[%s1604_s26 + $0x20] ss:$8 sps:$4 sm:$0xff]  }
  0x5f   : > { %755 = vmatpush1.bf16.msra.mxu1 %v1171_v8  ;;  %715 = vmatprep.subr.bf16.mxu0 %v1172_v9  ;;  %v1189_v20 = vld [vmem:[%s1604_s26 + $0x130] ss:$8 sps:$4 sm:$0xff]   ;;  %v1192_v22 = vld [vmem:[%s1604_s26 + $0x124] ss:$8 sps:$4 sm:$0xff]   ;;  %v1195_v24 = vld [vmem:[%s1604_s26 + $0x120] ss:$8 sps:$4 sm:$0xff]  }
  0x60   : > { %756 = vmatprep.subr.bf16.mxu1 %v1174_v10  ;;  %v1196_v25 = vld [vmem:[%s1604_s26 + $0x14] ss:$8 sps:$4 sm:$0xff]   ;;  %v1200_v27 = vld [vmem:[%s1604_s26 + $0x10] ss:$8 sps:$4 sm:$0xff]   ;;  %v1202_v29 = vld [vmem:[%s1604_s26 + $0x4] ss:$8 sps:$4 sm:$0xff]  }
  0x61   : > { %v1198_v26 = vld [vmem:[%s1604_s26 + $0x114] ss:$8 sps:$4 sm:$0xff]   ;;  %v1201_v28 = vld [vmem:[%s1604_s26 + $0x110] ss:$8 sps:$4 sm:$0xff]   ;;  %v1204_v30 = vld [vmem:[%s1604_s26 + $0x104] ss:$8 sps:$4 sm:$0xff]  }
  0x62   : > { %716 = vmatpush1.bf16.msra.mxu0 %v1176_v11  ;;  %v1206_v31 = vld [vmem:[%s1604_s26] ss:$8 sps:$4 sm:$0xff]   ;;  %v1208_v33 = vld [vmem:[%s1604_s26 + $0xf4] ss:$8 sps:$4 sm:$0xff]   ;;  %v1212_v35 = vld [vmem:[%s1604_s26 + $0xf0] ss:$8 sps:$4 sm:$0xff]  }
  0x63   : > { %757 = vmatpush1.bf16.msra.mxu1 %v1177_v12  ;;  %717 = vmatprep.subr.bf16.mxu0 %v1178_v13  ;;  %v1207_v32 = vld [vmem:[%s1604_s26 + $0x100] ss:$8 sps:$4 sm:$0xff]   ;;  %v1210_v34 = vld [vmem:[%s1604_s26 + $0x1f4] ss:$8 sps:$4 sm:$0xff]   ;;  %v1213_v36 = vld [vmem:[%s1604_s26 + $0x1f0] ss:$8 sps:$4 sm:$0xff]  }
  0x64   : > { %758 = vmatprep.subr.bf16.mxu1 %v1180_v14  ;;  %v1214_v37 = vld [vmem:[%s1604_s26 + $0xe4] ss:$8 sps:$4 sm:$0xff]   ;;  %v1218_v39 = vld [vmem:[%s1604_s26 + $0xe0] ss:$8 sps:$4 sm:$0xff]   ;;  %v1220_v41 = vld [vmem:[%s1604_s26 + $0xd4] ss:$8 sps:$4 sm:$0xff]  }
  0x65   : > { %v1216_v38 = vld [vmem:[%s1604_s26 + $0x1e4] ss:$8 sps:$4 sm:$0xff]   ;;  %v1219_v40 = vld [vmem:[%s1604_s26 + $0x1e0] ss:$8 sps:$4 sm:$0xff]   ;;  %v1222_v42 = vld [vmem:[%s1604_s26 + $0x1d4] ss:$8 sps:$4 sm:$0xff]  }
  0x66   : > { %718 = vmatpush1.bf16.msra.mxu0 %v1182_v15  ;;  %v1224_v43 = vld [vmem:[%s1604_s26 + $0xd0] ss:$8 sps:$4 sm:$0xff]   ;;  %v1226_v45 = vld [vmem:[%s1604_s26 + $0xc4] ss:$8 sps:$4 sm:$0xff]   ;;  %v1230_v50 = vld [vmem:[%s1604_s26 + $0xc0] ss:$8 sps:$4 sm:$0xff]  }
  0x67   : > { %759 = vmatpush1.bf16.msra.mxu1 %v1183_v16  ;;  %719 = vmatprep.subr.bf16.mxu0 %v1184_v17  ;;  %v1225_v44 = vld [vmem:[%s1604_s26 + $0x1d0] ss:$8 sps:$4 sm:$0xff]   ;;  %v1228_v46 = vld [vmem:[%s1604_s26 + $0x1c4] ss:$8 sps:$4 sm:$0xff]   ;;  %v1231_v51 = vld [vmem:[%s1604_s26 + $0x1c0] ss:$8 sps:$4 sm:$0xff]  }
  0x68   : > { %760 = vmatprep.subr.bf16.mxu1 %v1186_v18  ;;  %v311_v47 = vld [vmem:[%s1623_s28] sm:$0xff]  ;;  %v312_v49 = vld [vmem:[%s1623_s28 + $0x8] sm:$0xff]  ;;  %v1238_v57 = vld [vmem:[%s1604_s26 + $0xa4] ss:$8 sps:$4 sm:$0xff]   ;;  %p1051_p0 = scmp.ne.s32.totalorder %s1394_s18, 3 }
  0x69   : > { %v984_v48 = vcombine.high %v311_v47, %v311_v47  ;;  %v986_v52 = vcombine.high %v312_v49, %v312_v49  ;;  %v1232_v53 = vld [vmem:[%s1604_s26 + $0xb4] ss:$8 sps:$4 sm:$0xff]   ;;  %v1236_v55 = vld [vmem:[%s1604_s26 + $0xb0] ss:$8 sps:$4 sm:$0xff]   ;;  %v1240_v58 = vld [vmem:[%s1604_s26 + $0x1a4] ss:$8 sps:$4 sm:$0xff]   ;;  %v983_v5 = vcombine.low %v311_v47, %v311_v47  ;;  %v985_v6 = vcombine.low %v312_v49, %v312_v49 }
  0x6a   : > { %720 = vmatpush1.bf16.msra.mxu0 %v1188_v19  ;;  %v1234_v54 = vld [vmem:[%s1604_s26 + $0x1b4] ss:$8 sps:$4 sm:$0xff]   ;;  %v1237_v56 = vld [vmem:[%s1604_s26 + $0x1b0] ss:$8 sps:$4 sm:$0xff]   ;;  %v1242_v59 = vld [vmem:[%s1604_s26 + $0xa0] ss:$8 sps:$4 sm:$0xff]  }
  0x6b   : > { %761 = vmatpush1.bf16.msra.mxu1 %v1189_v20  ;;  %721 = vmatprep.subr.bf16.mxu0 %v1190_v21  ;;  %v1243_v60 = vld [vmem:[%s1604_s26 + $0x1a0] ss:$8 sps:$4 sm:$0xff]   ;;  %v1244_v61 = vld [vmem:[%s1604_s26 + $0x94] ss:$8 sps:$4 sm:$0xff]   ;;  %v1248_v63 = vld [vmem:[%s1604_s26 + $0x90] ss:$8 sps:$4 sm:$0xff]  }
  0x6c   : > { %762 = vmatprep.subr.bf16.mxu1 %v1192_v22  ;;  %743 = vmatprep.mubr.bf16.mxu0 %v984_v48  ;;  %v1246_v62 = vld [vmem:[%s1604_s26 + $0x194] ss:$8 sps:$4 sm:$0xff]   ;;  %v1249_v0 = vld [vmem:[%s1604_s26 + $0x190] ss:$8 sps:$4 sm:$0xff]   ;;  %v1250_v1 = vld [vmem:[%s1604_s26 + $0x84] ss:$8 sps:$4 sm:$0xff]  }
  0x6d   : > { %784 = vmatprep.mubr.bf16.mxu1 %v986_v52  ;;  %v1252_v2 = vld [vmem:[%s1604_s26 + $0x184] ss:$8 sps:$4 sm:$0xff]   ;;  %v1254_v3 = vld [vmem:[%s1604_s26 + $0x80] ss:$8 sps:$4 sm:$0xff]   ;;  %v309_v8 = vld [vmem:[#allocation2] sm:$0xff] }
  0x6e   : > { %722 = vmatpush1.bf16.msra.mxu0 %v1194_v23  ;;  %v1255_v4 = vld [vmem:[%s1604_s26 + $0x180] ss:$8 sps:$4 sm:$0xff]   ;;  %v310_v12 = vld [vmem:[#allocation2 + $0x8] sm:$0xff] }
  0x6f   : > { %763 = vmatpush1.bf16.msra.mxu1 %v1195_v24  ;;  %723 = vmatprep.subr.bf16.mxu0 %v1196_v25 }
  0x70   : > { %764 = vmatprep.subr.bf16.mxu1 %v1198_v26 }
  0x72   : > { %724 = vmatpush1.bf16.msra.mxu0 %v1200_v27 }
  0x73   : > { %765 = vmatpush1.bf16.msra.mxu1 %v1201_v28  ;;  %725 = vmatprep.subr.bf16.mxu0 %v1202_v29 }
  0x74   : > { %766 = vmatprep.subr.bf16.mxu1 %v1204_v30 }
  0x76   : > { %726 = vmatpush1.bf16.msra.mxu0 %v1206_v31 }
  0x77   : > { %767 = vmatpush1.bf16.msra.mxu1 %v1207_v32  ;;  %727 = vmatprep.subr.bf16.mxu0 %v1208_v33 }
  0x78   : > { %768 = vmatprep.subr.bf16.mxu1 %v1210_v34 }
  0x7a   : > { %728 = vmatpush2.bf16.msra.mxu0 %v1212_v35 }
  0x7b   : > { %769 = vmatpush2.bf16.msra.mxu1 %v1213_v36  ;;  %729 = vmatprep.subr.bf16.mxu0 %v1214_v37 }
  0x7c   : > { %770 = vmatprep.subr.bf16.mxu1 %v1216_v38 }
  0x7e   : > { %730 = vmatpush2.bf16.msra.mxu0 %v1218_v39 }
  0x7f   : > { %771 = vmatpush2.bf16.msra.mxu1 %v1219_v40  ;;  %731 = vmatprep.subr.bf16.mxu0 %v1220_v41 }
  0x80   : > { %772 = vmatprep.subr.bf16.mxu1 %v1222_v42 }
  0x82   : > { %732 = vmatpush2.bf16.msra.mxu0 %v1224_v43 }
  0x83   : > { %773 = vmatpush2.bf16.msra.mxu1 %v1225_v44  ;;  %733 = vmatprep.subr.bf16.mxu0 %v1226_v45 }
  0x84   : > { %774 = vmatprep.subr.bf16.mxu1 %v1228_v46 }
  0x86   : > { %734 = vmatpush2.bf16.msra.mxu0 %v1230_v50 }
  0x87   : > { %775 = vmatpush2.bf16.msra.mxu1 %v1231_v51  ;;  %735 = vmatprep.subr.bf16.mxu0 %v1232_v53 }
  0x88   : > { %776 = vmatprep.subr.bf16.mxu1 %v1234_v54 }
  0x8a   : > { %736 = vmatpush2.bf16.msra.mxu0 %v1236_v55 }
  0x8b   : > { %777 = vmatpush2.bf16.msra.mxu1 %v1237_v56  ;;  %737 = vmatprep.subr.bf16.mxu0 %v1238_v57 }
  0x8c   : > { %778 = vmatprep.subr.bf16.mxu1 %v1240_v58 }
  0x8e   : > { %738 = vmatpush2.bf16.msra.mxu0 %v1242_v59 }
  0x8f   : > { %779 = vmatpush2.bf16.msra.mxu1 %v1243_v60  ;;  %739 = vmatprep.subr.bf16.mxu0 %v1244_v61 }
  0x90   : > { %780 = vmatprep.subr.bf16.mxu1 %v1246_v62 }
  0x92   : > { %740 = vmatpush2.bf16.msra.mxu0 %v1248_v63 }
  0x93   : > { %781 = vmatpush2.bf16.msra.mxu1 %v1249_v0  ;;  %741 = vmatprep.subr.bf16.mxu0 %v1250_v1 }
  0x94   : > { %782 = vmatprep.subr.bf16.mxu1 %v1252_v2 }
  0x96   : > { %742 = vmatpush2.bf16.msra.mxu0 %v1254_v3 }
  0x97   : > { %783 = vmatpush2.bf16.msra.mxu1 %v1255_v4 }
  0x99   : > { %744 = vmatmul.mubr.bf16.vlgmr.msra.gmra.mxu0 %v983_v5 }
  0x9a   : > { %785 = vmatmul.mubr.bf16.vlgmr.msra.gmra.mxu1 %v985_v6 }
 0x159   : > { %v745_v7 = vpop.f32.mrf.mxu0 }
 0x15a   : > { %v786_v9 = vpop.f32.mrf.mxu1 }
 0x15b   : > { %v787_v10 = vadd.f32 %v786_v9, %v745_v7  ;;  %v747_v11 = vpop.f32.mrf.mxu0 }
 0x15c   : > { %v788_v13 = vpop.f32.mrf.mxu1 }
 0x15d   : > { %v793_v14 = vadd.f32 %v787_v10, %v309_v8  ;;  %v789_v15 = vadd.f32 %v788_v13, %v747_v11  ;;  %v749_v16 = vpop.f32.mrf.mxu0  ;;  %800 = sbr.rel (%p1051_p0) target bundleno = 367 (0x16f), region = 48 }
 0x15e   : > { %v790_v17 = vpop.f32.mrf.mxu1 }
 0x15f   : > { %795 = vst [vmem:[#allocation2] sm:$0xff] %v793_v14  ;;  %v794_v18 = vadd.f32 %v789_v15, %v310_v12  ;;  %v750_v19 = vpop.f32.mrf.mxu0 }
 0x160   : > { %v791_v20 = vpop.f32.mrf.mxu1 }
 0x161   : > { %796 = vst [vmem:[#allocation2 + $0x8] sm:$0xff] %v794_v18 }
 0x162   : > { %v805_v21 = vlaneseq  ;;  %v803_v23 = vld [vmem:[%s239_s9] sm:$0x3] }
 0x164   : > { %v806_v22 = vshrl.u32 %v805_v21, 7 }
 0x166   : > { %v807_v24 = vsub.s32 0, %v806_v22  ;;  %v811_v25 = vsub.s32 1, %v806_v22  ;;  %v801_v26 = vld [vmem:[#allocation2] sm:$0xff] }
 0x168   : > { %v802_v27 = vld [vmem:[#allocation2 + $0x8] sm:$0xff]  ;;  %v808_v28 = vrot.slane %v803_v23, %v807_v24  ;;  %v812_v29 = vrot.slane %v803_v23, %v811_v25 }
 0x16a   : > { %v815_v30 = vadd.f32 %v808_v28, %v801_v26  ;;  %v816_v31 = vadd.f32 %v812_v29, %v802_v27 }
 0x16c   : > { %v817_v32 = vmax.f32 %v815_v30, 0.0  ;;  %v818_v33 = vmax.f32 %v816_v31, 0.0 }
 0x16e   : > { %819 = vst [vmem:[%s1628_s29] sm:$0xff] %v817_v32  ;;  %820 = vst [vmem:[%s1628_s29 + $0x8] sm:$0xff] %v818_v33 }
 0x16f PF: > { %s19_s22 = sadd.s32 1, %s1410_s22   ;;  %s1755_s10 = sld [smem:[#allocation9_spill]] }
 0x170   : > { %p16_p1 = scmp.ge.s32.totalorder %s19_s22, 18   ;;  %s1756_s26 = sld [smem:[#allocation10_spill]] }
 0x171   : > { %s1757_s12 = smov %s1374_s13  ;;  %s1758_s13 = smov %s1378_s14 }
 0x172   : > { %s1759_s14 = smov %s1578_s30  ;;  %s1760_s15 = smov %s1386_s16 }
 0x173   : > { %s1761_s16 = smov %s1390_s17  ;;  %s1762_s17 = smov %s1583_s27 }
 0x174   : > { %s1763_s18 = smov %s1402_s20  ;;  %s1764_s19 = smov %s1406_s21 }
 0x175   : > { %s1765_s20 = smov %s1755_s10  ;;  %18 = sbr.rel (!%p16_p1) target bundleno = 11 (0xb), region = 96 }
 0x176   : > { %s1766_s21 = smov %s1756_s26 }
 0x17a   :  { %851 = vsyncpa [#allocation4], 1 }
 0x17b   :  { %853 = vsyncpa [#allocation4 + $0x1], 1 }
 0x17c   :  { %854 = vsyncpa [#allocation6], 1 }
 0x17d   :  { %856 = vsyncpa [#allocation6 + $0x1], 1 }

// kernel: inception_aux_forward.7
= control target key start
LH: loop header
LB: loop body
LE: loop exit
PB: predicated region body
PF: predicated region fallthrough
CT: control target
= control target key end

     0   :  { %s940_s12 = smov 0   ;;  %s942_s13 = smov 0   ;;  %s1023_s0 = inlined_call_operand.vmem [shape: bf16[8,1024], index: 0, kind: input, shape index: {}]   ;;  %s1024_s1 = inlined_call_operand.vmem [shape: bf16[1024,128], index: 1, kind: input, shape index: {}]   ;;  %s1025_s2 = inlined_call_operand.vmem [shape: f32[1,128], index: 2, kind: input, shape index: {}]   ;;  %s1026_s3 = inlined_call_operand.vmem [shape: f32[8,128], index: 3, kind: output, shape index: {}]  }
   0x1   :  { %s944_s14 = smov 0  }
   0x2 LB: > { %s25_s15 = sadd.s32 1, %s913_s13  ;;  %p743_p0 = scmp.ge.s32.totalorder %s917_s14, 1  ;;  %s917_s14 = sphi %s944_s14, %s13_s14   ;;  %s913_s13 = sphi %s942_s13, %s1028_s13   ;;  %s909_s12 = sphi %s940_s12, %s1027_s12  }
   0x3   : > { %p26_p1 = scmp.ge.s32.totalorder %s25_s15, 2  ;;  %p189_p2 = scmp.lt.s32.totalorder %s917_s14, 3 }
   0x5   : > { %s1030_s15 = smov (%p26_p1, %s25_s15), 0  ;;  %p190_p3 = pnand %p743_p0, %p189_p2 }
   0x6   : > { %s744_s16 = sshll.u32 (!%p190_p3), %s909_s12, 2  ;;  %s746_s17 = sshll.u32 (!%p190_p3), %s909_s12, 6 }
   0x7   : > { %193 = sbr.rel (%p190_p3) target bundleno = 269 (0x10d), region = 32  ;;  %p233_p4 = scmp.lt.s32.totalorder (!%p190_p3), %s744_s16, 7 }
   0x8   : > { %p241_p5 = scmp.lt.s32.totalorder (!%p190_p3), %s746_s17, 127  ;;  %p748_p6 = scmp.ne.s32.totalorder (!%p190_p3), %s909_s12, 0 }
   0xc   : > { %s1032_s16 = smov (!%p233_p4, %s744_s16), 7  ;;  %s1034_s17 = smov (!%p241_p5, %s746_s17), 127 }
   0xd   : > { %s745_s18 = sshll.u32 %s1032_s16, 2  ;;  %s747_s22 = sshll.u32 %s1034_s17, 2 }
   0xe   : > { %s965_s21 = scalar_lea.vmem %s1023_s0, %s745_s18  ;;  %s970_s25 = scalar_lea.vmem %s1024_s1, %s747_s22 }
   0xf   : > { %263 = sbr.rel (%p748_p6) target bundleno = 22 (0x16), region = 36 }
  0x14   : > { %v919_v0 = vmov 0.0  }
  0x15   : > { %264 = vst [vmem:[#allocation2] sm:$0xff] %v919_v0 }
  0x16 PF: > { %v859_v1 = vld [vmem:[%s970_s25 + $0x78] sm:$0xff]   ;;  %v863_v5 = vld [vmem:[%s970_s25 + $0x70] sm:$0xff]   ;;  %v867_v9 = vld [vmem:[%s970_s25 + $0x68] sm:$0xff]   ;;  %p785_p7 = scmp.ne.s32.totalorder %s909_s12, 1 }
  0x17   : > { %v860_v2 = vld [vmem:[%s970_s25 + $0xf8] sm:$0xff]   ;;  %790 = vmatprep.subr.bf16.mxu0 %v859_v1  ;;  %v864_v6 = vld [vmem:[%s970_s25 + $0xf0] sm:$0xff]   ;;  %v868_v10 = vld [vmem:[%s970_s25 + $0xe8] sm:$0xff]  }
  0x18   : > { %v861_v3 = vld [vmem:[%s970_s25 + $0x38] sm:$0xff]   ;;  %812 = vmatprep.subr.bf16.mxu1 %v860_v2  ;;  %v865_v7 = vld [vmem:[%s970_s25 + $0x30] sm:$0xff]   ;;  %v869_v11 = vld [vmem:[%s970_s25 + $0x28] sm:$0xff]  }
  0x19   : > { %v862_v4 = vld [vmem:[%s970_s25 + $0xb8] sm:$0xff]   ;;  %791 = vmatpush3.bf16.msra.mxu0 %v861_v3  ;;  %v866_v8 = vld [vmem:[%s970_s25 + $0xb0] sm:$0xff]   ;;  %v870_v12 = vld [vmem:[%s970_s25 + $0xa8] sm:$0xff]  }
  0x1a   : > { %813 = vmatpush3.bf16.msra.mxu1 %v862_v4  ;;  %792 = vmatprep.subr.bf16.mxu0 %v863_v5  ;;  %v871_v13 = vld [vmem:[%s970_s25 + $0x60] sm:$0xff]   ;;  %v875_v17 = vld [vmem:[%s970_s25 + $0x58] sm:$0xff]   ;;  %v879_v21 = vld [vmem:[%s970_s25 + $0x50] sm:$0xff]  }
  0x1b   : > { %814 = vmatprep.subr.bf16.mxu1 %v864_v6  ;;  %v872_v14 = vld [vmem:[%s970_s25 + $0xe0] sm:$0xff]   ;;  %v876_v18 = vld [vmem:[%s970_s25 + $0xd8] sm:$0xff]   ;;  %v880_v22 = vld [vmem:[%s970_s25 + $0xd0] sm:$0xff]  }
  0x1c   : > { %v873_v15 = vld [vmem:[%s970_s25 + $0x20] sm:$0xff]   ;;  %v877_v19 = vld [vmem:[%s970_s25 + $0x18] sm:$0xff]   ;;  %v881_v23 = vld [vmem:[%s970_s25 + $0x10] sm:$0xff]  }
  0x1d   : > { %793 = vmatpush3.bf16.msra.mxu0 %v865_v7  ;;  %v874_v16 = vld [vmem:[%s970_s25 + $0xa0] sm:$0xff]   ;;  %v878_v20 = vld [vmem:[%s970_s25 + $0x98] sm:$0xff]   ;;  %v882_v24 = vld [vmem:[%s970_s25 + $0x90] sm:$0xff]  }
  0x1e   : > { %815 = vmatpush3.bf16.msra.mxu1 %v866_v8  ;;  %794 = vmatprep.subr.bf16.mxu0 %v867_v9  ;;  %v883_v25 = vld [vmem:[%s970_s25 + $0x48] sm:$0xff]   ;;  %v887_v29 = vld [vmem:[%s970_s25 + $0x40] sm:$0xff]  }
  0x1f   : > { %816 = vmatprep.subr.bf16.mxu1 %v868_v10  ;;  %v884_v26 = vld [vmem:[%s970_s25 + $0xc8] sm:$0xff]   ;;  %v888_v30 = vld [vmem:[%s970_s25 + $0xc0] sm:$0xff]  }
  0x20   : > { %v885_v27 = vld [vmem:[%s970_s25 + $0x8] sm:$0xff]   ;;  %v889_v31 = vld [vmem:[%s970_s25] sm:$0xff]  }
  0x21   : > { %795 = vmatpush3.bf16.msra.mxu0 %v869_v11  ;;  %v886_v28 = vld [vmem:[%s970_s25 + $0x88] sm:$0xff]   ;;  %v890_v32 = vld [vmem:[%s970_s25 + $0x80] sm:$0xff]  }
  0x22   : > { %817 = vmatpush3.bf16.msra.mxu1 %v870_v12  ;;  %796 = vmatprep.subr.bf16.mxu0 %v871_v13  ;;  %v266_v33 = vld [vmem:[%s965_s21] sm:$0xff]  ;;  %v267_v34 = vld [vmem:[%s965_s21 + $0x8] sm:$0xff] }
  0x23   : > { %818 = vmatprep.subr.bf16.mxu1 %v872_v14  ;;  %v749_v35 = vcombine.low %v266_v33, %v266_v33  ;;  %v750_v36 = vcombine.high %v266_v33, %v266_v33  ;;  %v751_v37 = vcombine.low %v267_v34, %v267_v34  ;;  %v752_v38 = vcombine.high %v267_v34, %v267_v34  ;;  %v265_v45 = vld [vmem:[#allocation2] sm:$0xff] }
  0x25   : > { %797 = vmatpush3.bf16.msra.mxu0 %v873_v15  ;;  %570 = vmatprep.mubr.bf16.mxu0 %v750_v36 }
  0x26   : > { %819 = vmatpush3.bf16.msra.mxu1 %v874_v16  ;;  %798 = vmatprep.subr.bf16.mxu0 %v875_v17 }
  0x27   : > { %820 = vmatprep.subr.bf16.mxu1 %v876_v18  ;;  %610 = vmatprep.mubr.bf16.mxu1 %v752_v38 }
  0x29   : > { %799 = vmatpush3.bf16.msra.mxu0 %v877_v19 }
  0x2a   : > { %821 = vmatpush3.bf16.msra.mxu1 %v878_v20  ;;  %800 = vmatprep.subr.bf16.mxu0 %v879_v21 }
  0x2b   : > { %822 = vmatprep.subr.bf16.mxu1 %v880_v22 }
  0x2d   : > { %801 = vmatpush3.bf16.msra.mxu0 %v881_v23 }
  0x2e   : > { %823 = vmatpush3.bf16.msra.mxu1 %v882_v24  ;;  %802 = vmatprep.subr.bf16.mxu0 %v883_v25 }
  0x2f   : > { %824 = vmatprep.subr.bf16.mxu1 %v884_v26 }
  0x31   : > { %803 = vmatpush3.bf16.msra.mxu0 %v885_v27 }
  0x32   : > { %825 = vmatpush3.bf16.msra.mxu1 %v886_v28  ;;  %804 = vmatprep.subr.bf16.mxu0 %v887_v29 }
  0x33   : > { %826 = vmatprep.subr.bf16.mxu1 %v888_v30 }
  0x35   : > { %805 = vmatpush3.bf16.msra.mxu0 %v889_v31 }
  0x36   : > { %827 = vmatpush3.bf16.msra.mxu1 %v890_v32 }
  0x38   : > { %571 = vmatmul.mubr.bf16.vlgmr.msra.gmra.mxu0 %v749_v35 }
  0x39   : > { %611 = vmatmul.mubr.bf16.vlgmr.msra.gmra.mxu1 %v751_v37 }
  0xf8   : > { %v806_v39 = vpop.f32.mrf.mxu0 }
  0xf9   : > { %v828_v40 = vpop.f32.mrf.mxu1 }
  0xfa   : > { %v807_v41 = vpop.f32.mrf.mxu0 }
  0xfb   : > { %v829_v42 = vpop.f32.mrf.mxu1  ;;  %v808_v43 = vadd.f32 %v807_v41, %v806_v39 }
  0xfc   : > { %v830_v44 = vadd.f32 %v829_v42, %v828_v40  ;;  %v809_v46 = vpop.f32.mrf.mxu0 }
  0xfd   : > { %v831_v47 = vpop.f32.mrf.mxu1 }
  0xfe   : > { %v613_v48 = vadd.f32 %v830_v44, %v808_v43  ;;  %v810_v49 = vpop.f32.mrf.mxu0  ;;  %623 = sbr.rel (%p785_p7) target bundleno = 269 (0x10d), region = 40 }
  0xff   : > { %v832_v50 = vpop.f32.mrf.mxu1 }
 0x100   : > { %v618_v51 = vadd.f32 %v613_v48, %v265_v45 }
 0x102   : > { %619 = vst [vmem:[#allocation2] sm:$0xff] %v618_v51 }
 0x103   : > { %v786_v53 = vld [vmem:[%s1025_s2] ss:$0 sm:$0xff] }
 0x109   : > { %v624_v52 = vld [vmem:[#allocation2] sm:$0xff] }
 0x10a   : > { %v632_v54 = vadd.f32 %v786_v53, %v624_v52 }
 0x10c   : > { %633 = vst [vmem:[%s1026_s3] sm:$0xff] %v632_v54 }
 0x10d PF: > { %s13_s14 = sadd.s32 1, %s917_s14   ;;  %s1027_s12 = smov %s913_s13 }
 0x10e   : > { %p10_p8 = scmp.ge.s32.totalorder %s13_s14, 4   ;;  %s1028_s13 = smov %s1030_s15 }
 0x110   :  { %12 = sbr.rel (!%p10_p8) target bundleno = 2 (0x2), region = 76 }

</bundles_post_ra>
